<compile_context>
chip_gen: v7x
topology: tpu7x:2x2x1
jax: 0.10.0
libtpu: 0.0.40
codegen_flags: <defaults>
</compile_context>

<pallas_src>
import functools

import jax
import jax.numpy as jnp
from jax.experimental import pallas as pl
from jax.experimental.pallas import tpu as pltpu


def _layer_norm(z, gamma, beta, eps=1e-5):
    mu = jnp.mean(z, axis=-1, keepdims=True)
    var = jnp.mean(jnp.square(z - mu), axis=-1, keepdims=True)
    return (z - mu) * jax.lax.rsqrt(var + eps) * gamma + beta


def _make_kernel(N, T, P, H, L, temperature):
    inv_temp = 1.0 / float(temperature)
    HP = H * P

    def kernel(x_ref, wqkv_ref, bqkv_ref, wfc_ref, bfc_ref, g1_ref, be1_ref,
               w1_ref, bw1_ref, w2_ref, bw2_ref, g2_ref, be2_ref,
               wp_ref, bp_ref, o_ref):
        # NOTE: all dropout layers are identity (inference mode).
        # Whole batch processed at once: activation lives as (N*T, P).
        x_all = x_ref[...].reshape(N * T, P)
        for l in range(L):                                     # static unroll (L small)
            # ---- fused q/k/v projection for all heads: one (N*T,P)@(P,3*H*P) matmul
            qkv = jnp.dot(x_all, wqkv_ref[l],
                          preferred_element_type=jnp.float32) + bqkv_ref[l]
            head_outs = []
            for h in range(H):                                 # static unroll (H small)
                qh = qkv[:, h * P:(h + 1) * P].reshape(N, T, P)
                kh = qkv[:, HP + h * P:HP + (h + 1) * P].reshape(N, T, P)
                vh = qkv[:, 2 * HP + h * P:2 * HP + (h + 1) * P].reshape(N, T, P)
                s = jnp.einsum('ntd,nsd->nts', qh, kh,
                               preferred_element_type=jnp.float32) * inv_temp
                s = s - jnp.max(s, axis=-1, keepdims=True)
                e = jnp.exp(s)
                p = e / jnp.sum(e, axis=-1, keepdims=True)
                oh = jnp.einsum('nts,nsd->ntd', p, vh,
                                preferred_element_type=jnp.float32)
                head_outs.append(oh.reshape(N * T, P))
            # ---- concat heads along lanes + single fc matmul (K = H*P)
            o_cat = jnp.concatenate(head_outs, axis=-1)        # (N*T, H*P)
            fc_out = jnp.dot(o_cat, wfc_ref[l],
                             preferred_element_type=jnp.float32) + bfc_ref[l]
            x_att = _layer_norm(fc_out + x_all, g1_ref[l], be1_ref[l])
            # ---- position-wise feed forward (1x1 convs == Linears)
            h1 = jnp.dot(x_att, w1_ref[l],
                         preferred_element_type=jnp.float32) + bw1_ref[l]
            h1 = jnp.maximum(h1, 0.0)
            h2 = jnp.dot(h1, w2_ref[l],
                         preferred_element_type=jnp.float32) + bw2_ref[l]
            x_all = _layer_norm(h2 + x_att, g2_ref[l], be2_ref[l])
        # ---- flatten + Linear(T*P -> E_pad): lane-concat over t, single K=T*P matmul
        x3 = x_all.reshape(N, T, P)
        x_flat = jnp.concatenate([x3[:, t, :] for t in range(T)], axis=-1)  # (N, T*P)
        o_ref[...] = jnp.dot(x_flat, wp_ref[...],
                             preferred_element_type=jnp.float32) + bp_ref[...]

    return kernel


def embedding_self_att_forward(x, params, *, n_head):
    N, T, P = x.shape
    H = n_head
    L = params['wq'].shape[0]
    E = params['wp'].shape[1]
    E_pad = ((E + 127) // 128) * 128
    temperature = float(P) ** 0.5          # d_k = in_planes

    # Wrapper-side weight reorg only (concats / reshapes / zero-pads); x is untouched.
    WQKV = jnp.concatenate([params['wq'], params['wk'], params['wv']], axis=-1)   # (L,P,3HP)
    BQKV = jnp.concatenate([params['bq'], params['bk'], params['bv']],
                           axis=-1).reshape(L, 1, 3 * H * P)
    WFC = params['wfc']                                  # (L, H*P, P)
    BFC = params['bfc'].reshape(L, 1, P)
    G1 = params['ln1_g'].reshape(L, 1, P)
    BE1 = params['ln1_b'].reshape(L, 1, P)
    W1 = params['w1']
    BW1 = params['b1'].reshape(L, 1, P)
    W2 = params['w2']
    BW2 = params['b2'].reshape(L, 1, P)
    G2 = params['ln2_g'].reshape(L, 1, P)
    BE2 = params['ln2_b'].reshape(L, 1, P)
    WP = jnp.pad(params['wp'], ((0, 0), (0, E_pad - E)))                 # (T*P, E_pad)
    BP = jnp.pad(params['bp'].reshape(1, E), ((0, 0), (0, E_pad - E)))   # (1, E_pad)

    inputs = (x, WQKV, BQKV, WFC, BFC, G1, BE1,
              W1, BW1, W2, BW2, G2, BE2, WP, BP)

    kernel = _make_kernel(N, T, P, H, L, temperature)

    bytes_accessed = sum(int(a.size) for a in inputs) * 4 + N * E_pad * 4
    flops = (L * (2 * (N * T) * P * (3 * H * P)          # fused q/k/v projection
                  + H * (2 * N * T * T * P               # scores
                         + 2 * N * T * T * P)            # attn @ v
                  + 2 * (N * T) * (H * P) * P            # fc
                  + 2 * 2 * (N * T) * P * P)             # feed-forward
             + 2 * N * (T * P) * E_pad)                  # final projection
    transcendentals = L * H * N * T * T                  # softmax exp

    out_padded = pl.pallas_call(
        kernel,
        out_shape=jax.ShapeDtypeStruct((N, E_pad), jnp.float32),
        in_specs=[pl.BlockSpec(memory_space=pltpu.MemorySpace.VMEM)] * len(inputs),
        out_specs=pl.BlockSpec(memory_space=pltpu.MemorySpace.VMEM),
        cost_estimate=pl.CostEstimate(flops=flops,
                                      transcendentals=transcendentals,
                                      bytes_accessed=bytes_accessed),
    )(*inputs)
    return out_padded[:, :E]


def embedding_self_att_ref(x, params, *, n_head):
    """Pure-JAX reference mirroring the PyTorch forward (dropout == identity)."""
    N, T, P = x.shape
    H = n_head
    L = params['wq'].shape[0]
    temperature = float(P) ** 0.5
    h = x
    for l in range(L):
        resid = h
        q = jnp.einsum('ntp,pq->ntq', h, params['wq'][l]) + params['bq'][l]
        k = jnp.einsum('ntp,pq->ntq', h, params['wk'][l]) + params['bk'][l]
        v = jnp.einsum('ntp,pq->ntq', h, params['wv'][l]) + params['bv'][l]
        qh = q.reshape(N, T, H, P)
        kh = k.reshape(N, T, H, P)
        vh = v.reshape(N, T, H, P)
        s = jnp.einsum('nthd,nshd->nhts', qh, kh) / temperature
        a = jax.nn.softmax(s, axis=-1)
        o = jnp.einsum('nhts,nshd->nthd', a, vh).reshape(N, T, H * P)
        fc = jnp.einsum('ntq,qp->ntp', o, params['wfc'][l]) + params['bfc'][l]
        h = _layer_norm(fc + resid, params['ln1_g'][l], params['ln1_b'][l])
        f1 = jax.nn.relu(jnp.einsum('ntp,pq->ntq', h, params['w1'][l]) + params['b1'][l])
        f2 = jnp.einsum('ntq,qp->ntp', f1, params['w2'][l]) + params['b2'][l]
        h = _layer_norm(f2 + h, params['ln2_g'][l], params['ln2_b'][l])
    return h.reshape(N, T * P) @ params['wp'] + params['bp']


if __name__ == "__main__":
    # Embedding_self_att(in_timestep=8, in_planes=32, n_head=2, n_layers=2, embed_dim=300)
    N = 2        # batch
    T = 8        # in_timestep
    P = 32       # in_planes (= d_model = d_k = d_v = d_inner)
    H = 2        # n_head
    L = 2        # n_layers
    E = 300      # embed_dim

    key = jax.random.PRNGKey(0)
    ki = iter(jax.random.split(key, 20))

    def nrm(k, shape, std):
        return std * jax.random.normal(k, shape, dtype=jnp.float32)

    def uni(k, shape, bound):
        return jax.random.uniform(k, shape, minval=-bound, maxval=bound, dtype=jnp.float32)

    s_qkv = (2.0 / (P + P)) ** 0.5
    params = dict(
        wq=nrm(next(ki), (L, P, H * P), s_qkv), bq=uni(next(ki), (L, H * P), P ** -0.5),
        wk=nrm(next(ki), (L, P, H * P), s_qkv), bk=uni(next(ki), (L, H * P), P ** -0.5),
        wv=nrm(next(ki), (L, P, H * P), s_qkv), bv=uni(next(ki), (L, H * P), P ** -0.5),
        wfc=nrm(next(ki), (L, H * P, P), (2.0 / (H * P + P)) ** 0.5),
        bfc=uni(next(ki), (L, P), (H * P) ** -0.5),
        ln1_g=1.0 + 0.1 * jax.random.normal(next(ki), (L, P), dtype=jnp.float32),
        ln1_b=0.1 * jax.random.normal(next(ki), (L, P), dtype=jnp.float32),
        w1=uni(next(ki), (L, P, P), P ** -0.5), b1=uni(next(ki), (L, P), P ** -0.5),
        w2=uni(next(ki), (L, P, P), P ** -0.5), b2=uni(next(ki), (L, P), P ** -0.5),
        ln2_g=1.0 + 0.1 * jax.random.normal(next(ki), (L, P), dtype=jnp.float32),
        ln2_b=0.1 * jax.random.normal(next(ki), (L, P), dtype=jnp.float32),
        wp=uni(next(ki), (T * P, E), (T * P) ** -0.5),
        bp=uni(next(ki), (E,), (T * P) ** -0.5),
    )
    x = jax.random.normal(next(ki), (N, T, P), dtype=jnp.float32)

    fwd = jax.jit(functools.partial(embedding_self_att_forward, n_head=H))
    out = jax.block_until_ready(fwd(x, params))

    ref = embedding_self_att_ref(x, params, n_head=H)
    assert out.shape == (N, E)
    assert jnp.allclose(out, ref, atol=1e-4, rtol=1e-4), float(jnp.max(jnp.abs(out - ref)))
    print("KERNEL_OK")
</pallas_src>

<mosaic_0001>
module attributes {stable_mosaic.version = 11 : i64} {
  func.func @kernel(%arg0: memref<2x8x32xf32, #tpu.memory_space<vmem>>, %arg1: memref<2x32x192xf32, #tpu.memory_space<vmem>>, %arg2: memref<2x1x192xf32, #tpu.memory_space<vmem>>, %arg3: memref<2x64x32xf32, #tpu.memory_space<vmem>>, %arg4: memref<2x1x32xf32, #tpu.memory_space<vmem>>, %arg5: memref<2x1x32xf32, #tpu.memory_space<vmem>>, %arg6: memref<2x1x32xf32, #tpu.memory_space<vmem>>, %arg7: memref<2x32x32xf32, #tpu.memory_space<vmem>>, %arg8: memref<2x1x32xf32, #tpu.memory_space<vmem>>, %arg9: memref<2x32x32xf32, #tpu.memory_space<vmem>>, %arg10: memref<2x1x32xf32, #tpu.memory_space<vmem>>, %arg11: memref<2x1x32xf32, #tpu.memory_space<vmem>>, %arg12: memref<2x1x32xf32, #tpu.memory_space<vmem>>, %arg13: memref<256x384xf32, #tpu.memory_space<vmem>>, %arg14: memref<1x384xf32, #tpu.memory_space<vmem>>, %arg15: memref<2x384xf32, #tpu.memory_space<vmem>>) attributes {dimension_semantics = [], scalar_prefetch = 0 : i64, scratch_operands = 0 : i64, tpu.core_type = #tpu.core_type<tc>} {
    %c0 = arith.constant 0 : index
    %c0_0 = arith.constant 0 : index
    %c0_1 = arith.constant 0 : index
    %0 = vector.load %arg0[%c0, %c0_0, %c0_1] : memref<2x8x32xf32, #tpu.memory_space<vmem>>, vector<2x8x32xf32>
    %1 = vector.shape_cast %0 : vector<2x8x32xf32> to vector<16x32xf32>
    %c0_2 = arith.constant 0 : index
    %c0_3 = arith.constant 0 : index
    %c0_4 = arith.constant 0 : index
    %2 = vector.load %arg1[%c0_2, %c0_3, %c0_4] : memref<2x32x192xf32, #tpu.memory_space<vmem>>, vector<1x32x192xf32>
    %3 = vector.shape_cast %2 : vector<1x32x192xf32> to vector<32x192xf32>
    %cst = arith.constant dense<0.000000e+00> : vector<16x192xf32>
    %4 = tpu.matmul %1, %3, %cst {dimension_numbers = #tpu.dot_dimension_numbers<[1], [0], [0], [1], [0, 0, 1, 1], [], []>} : vector<16x32xf32>, vector<32x192xf32>, vector<16x192xf32> -> vector<16x192xf32>
    %c0_5 = arith.constant 0 : index
    %c0_6 = arith.constant 0 : index
    %c0_7 = arith.constant 0 : index
    %5 = vector.load %arg2[%c0_5, %c0_6, %c0_7] : memref<2x1x192xf32, #tpu.memory_space<vmem>>, vector<1x1x192xf32>
    %6 = vector.shape_cast %5 : vector<1x1x192xf32> to vector<1x192xf32>
    %7 = vector.broadcast %6 : vector<1x192xf32> to vector<16x192xf32>
    %8 = arith.addf %4, %7 : vector<16x192xf32>
    %9 = vector.extract_strided_slice %8 {offsets = [0, 0], sizes = [16, 32], strides = [1, 1]} : vector<16x192xf32> to vector<16x32xf32>
    %10 = vector.shape_cast %9 : vector<16x32xf32> to vector<2x8x32xf32>
    %11 = vector.extract_strided_slice %8 {offsets = [0, 64], sizes = [16, 32], strides = [1, 1]} : vector<16x192xf32> to vector<16x32xf32>
    %12 = vector.shape_cast %11 : vector<16x32xf32> to vector<2x8x32xf32>
    %13 = vector.extract_strided_slice %8 {offsets = [0, 128], sizes = [16, 32], strides = [1, 1]} : vector<16x192xf32> to vector<16x32xf32>
    %14 = vector.shape_cast %13 : vector<16x32xf32> to vector<2x8x32xf32>
    "tpu.trace_start"() <{level = 10 : i32, message = "ntd,nsd->nts"}> : () -> ()
    %cst_8 = arith.constant dense<0.000000e+00> : vector<2x8x8xf32>
    %15 = tpu.matmul %10, %12, %cst_8 {dimension_numbers = #tpu.dot_dimension_numbers<[2], [2], [1], [1], [0, 0, 0, 1, 1, 1], [0], [0]>} : vector<2x8x32xf32>, vector<2x8x32xf32>, vector<2x8x8xf32> -> vector<2x8x8xf32>
    "tpu.trace_stop"() : () -> ()
    %cst_9 = arith.constant 0.176776692 : f32
    %16 = vector.broadcast %cst_9 : f32 to vector<2x8x8xf32>
    %17 = arith.mulf %15, %16 : vector<2x8x8xf32>
    %cst_10 = arith.constant dense<0xFF800000> : vector<2x8xf32>
    %18 = vector.multi_reduction <maximumf>, %17, %cst_10 [2] : vector<2x8x8xf32> to vector<2x8xf32>
    %19 = vector.shape_cast %18 : vector<2x8xf32> to vector<2x8x1xf32>
    %20 = vector.broadcast %19 : vector<2x8x1xf32> to vector<2x8x8xf32>
    %21 = arith.subf %17, %20 : vector<2x8x8xf32>
    %22 = math.exp %21 : vector<2x8x8xf32>
    %cst_11 = arith.constant dense<0.000000e+00> : vector<2x8xf32>
    %23 = vector.multi_reduction <add>, %22, %cst_11 [2] : vector<2x8x8xf32> to vector<2x8xf32>
    %24 = vector.shape_cast %23 : vector<2x8xf32> to vector<2x8x1xf32>
    %25 = vector.broadcast %24 : vector<2x8x1xf32> to vector<2x8x8xf32>
    %26 = arith.divf %22, %25 : vector<2x8x8xf32>
    "tpu.trace_start"() <{level = 10 : i32, message = "nts,nsd->ntd"}> : () -> ()
    %cst_12 = arith.constant dense<0.000000e+00> : vector<2x8x32xf32>
    %27 = tpu.matmul %26, %14, %cst_12 {dimension_numbers = #tpu.dot_dimension_numbers<[2], [1], [1], [2], [0, 0, 0, 1, 1, 2], [0], [0]>} : vector<2x8x8xf32>, vector<2x8x32xf32>, vector<2x8x32xf32> -> vector<2x8x32xf32>
    "tpu.trace_stop"() : () -> ()
    %28 = vector.shape_cast %27 : vector<2x8x32xf32> to vector<16x32xf32>
    %29 = vector.extract_strided_slice %8 {offsets = [0, 32], sizes = [16, 32], strides = [1, 1]} : vector<16x192xf32> to vector<16x32xf32>
    %30 = vector.shape_cast %29 : vector<16x32xf32> to vector<2x8x32xf32>
    %31 = vector.extract_strided_slice %8 {offsets = [0, 96], sizes = [16, 32], strides = [1, 1]} : vector<16x192xf32> to vector<16x32xf32>
    %32 = vector.shape_cast %31 : vector<16x32xf32> to vector<2x8x32xf32>
    %33 = vector.extract_strided_slice %8 {offsets = [0, 160], sizes = [16, 32], strides = [1, 1]} : vector<16x192xf32> to vector<16x32xf32>
    %34 = vector.shape_cast %33 : vector<16x32xf32> to vector<2x8x32xf32>
    "tpu.trace_start"() <{level = 10 : i32, message = "ntd,nsd->nts"}> : () -> ()
    %cst_13 = arith.constant dense<0.000000e+00> : vector<2x8x8xf32>
    %35 = tpu.matmul %30, %32, %cst_13 {dimension_numbers = #tpu.dot_dimension_numbers<[2], [2], [1], [1], [0, 0, 0, 1, 1, 1], [0], [0]>} : vector<2x8x32xf32>, vector<2x8x32xf32>, vector<2x8x8xf32> -> vector<2x8x8xf32>
    "tpu.trace_stop"() : () -> ()
    %cst_14 = arith.constant 0.176776692 : f32
    %36 = vector.broadcast %cst_14 : f32 to vector<2x8x8xf32>
    %37 = arith.mulf %35, %36 : vector<2x8x8xf32>
    %cst_15 = arith.constant dense<0xFF800000> : vector<2x8xf32>
    %38 = vector.multi_reduction <maximumf>, %37, %cst_15 [2] : vector<2x8x8xf32> to vector<2x8xf32>
    %39 = vector.shape_cast %38 : vector<2x8xf32> to vector<2x8x1xf32>
    %40 = vector.broadcast %39 : vector<2x8x1xf32> to vector<2x8x8xf32>
    %41 = arith.subf %37, %40 : vector<2x8x8xf32>
    %42 = math.exp %41 : vector<2x8x8xf32>
    %cst_16 = arith.constant dense<0.000000e+00> : vector<2x8xf32>
    %43 = vector.multi_reduction <add>, %42, %cst_16 [2] : vector<2x8x8xf32> to vector<2x8xf32>
    %44 = vector.shape_cast %43 : vector<2x8xf32> to vector<2x8x1xf32>
    %45 = vector.broadcast %44 : vector<2x8x1xf32> to vector<2x8x8xf32>
    %46 = arith.divf %42, %45 : vector<2x8x8xf32>
    "tpu.trace_start"() <{level = 10 : i32, message = "nts,nsd->ntd"}> : () -> ()
    %cst_17 = arith.constant dense<0.000000e+00> : vector<2x8x32xf32>
    %47 = tpu.matmul %46, %34, %cst_17 {dimension_numbers = #tpu.dot_dimension_numbers<[2], [1], [1], [2], [0, 0, 0, 1, 1, 2], [0], [0]>} : vector<2x8x8xf32>, vector<2x8x32xf32>, vector<2x8x32xf32> -> vector<2x8x32xf32>
    "tpu.trace_stop"() : () -> ()
    %48 = vector.shape_cast %47 : vector<2x8x32xf32> to vector<16x32xf32>
    %49 = tpu.concatenate %28, %48 in 1 : vector<16x32xf32>, vector<16x32xf32> -> vector<16x64xf32>
    %c0_18 = arith.constant 0 : index
    %c0_19 = arith.constant 0 : index
    %c0_20 = arith.constant 0 : index
    %50 = vector.load %arg3[%c0_18, %c0_19, %c0_20] : memref<2x64x32xf32, #tpu.memory_space<vmem>>, vector<1x64x32xf32>
    %51 = vector.shape_cast %50 : vector<1x64x32xf32> to vector<64x32xf32>
    %cst_21 = arith.constant dense<0.000000e+00> : vector<16x32xf32>
    %52 = tpu.matmul %49, %51, %cst_21 {dimension_numbers = #tpu.dot_dimension_numbers<[1], [0], [0], [1], [0, 0, 1, 1], [], []>} : vector<16x64xf32>, vector<64x32xf32>, vector<16x32xf32> -> vector<16x32xf32>
    %c0_22 = arith.constant 0 : index
    %c0_23 = arith.constant 0 : index
    %c0_24 = arith.constant 0 : index
    %53 = vector.load %arg4[%c0_22, %c0_23, %c0_24] : memref<2x1x32xf32, #tpu.memory_space<vmem>>, vector<1x1x32xf32>
    %54 = vector.shape_cast %53 : vector<1x1x32xf32> to vector<1x32xf32>
    %55 = vector.broadcast %54 : vector<1x32xf32> to vector<16x32xf32>
    %56 = arith.addf %52, %55 : vector<16x32xf32>
    %57 = arith.addf %56, %1 : vector<16x32xf32>
    %c0_25 = arith.constant 0 : index
    %c0_26 = arith.constant 0 : index
    %c0_27 = arith.constant 0 : index
    %58 = vector.load %arg5[%c0_25, %c0_26, %c0_27] : memref<2x1x32xf32, #tpu.memory_space<vmem>>, vector<1x1x32xf32>
    %59 = vector.shape_cast %58 : vector<1x1x32xf32> to vector<1x32xf32>
    %c0_28 = arith.constant 0 : index
    %c0_29 = arith.constant 0 : index
    %c0_30 = arith.constant 0 : index
    %60 = vector.load %arg6[%c0_28, %c0_29, %c0_30] : memref<2x1x32xf32, #tpu.memory_space<vmem>>, vector<1x1x32xf32>
    %61 = vector.shape_cast %60 : vector<1x1x32xf32> to vector<1x32xf32>
    %cst_31 = arith.constant dense<0.000000e+00> : vector<16xf32>
    %62 = vector.multi_reduction <add>, %57, %cst_31 [1] : vector<16x32xf32> to vector<16xf32>
    %63 = vector.shape_cast %62 : vector<16xf32> to vector<16x1xf32>
    %cst_32 = arith.constant 3.200000e+01 : f32
    %64 = vector.broadcast %cst_32 : f32 to vector<16x1xf32>
    %65 = arith.divf %63, %64 : vector<16x1xf32>
    %66 = vector.broadcast %65 : vector<16x1xf32> to vector<16x32xf32>
    %67 = arith.subf %57, %66 : vector<16x32xf32>
    %68 = arith.mulf %67, %67 : vector<16x32xf32>
    %cst_33 = arith.constant dense<0.000000e+00> : vector<16xf32>
    %69 = vector.multi_reduction <add>, %68, %cst_33 [1] : vector<16x32xf32> to vector<16xf32>
    %70 = vector.shape_cast %69 : vector<16xf32> to vector<16x1xf32>
    %cst_34 = arith.constant 3.200000e+01 : f32
    %71 = vector.broadcast %cst_34 : f32 to vector<16x1xf32>
    %72 = arith.divf %70, %71 : vector<16x1xf32>
    %73 = vector.broadcast %65 : vector<16x1xf32> to vector<16x32xf32>
    %74 = arith.subf %57, %73 : vector<16x32xf32>
    %cst_35 = arith.constant 9.99999974E-6 : f32
    %75 = vector.broadcast %cst_35 : f32 to vector<16x1xf32>
    %76 = arith.addf %72, %75 : vector<16x1xf32>
    %77 = math.rsqrt %76 : vector<16x1xf32>
    %78 = vector.broadcast %77 : vector<16x1xf32> to vector<16x32xf32>
    %79 = arith.mulf %74, %78 : vector<16x32xf32>
    %80 = vector.broadcast %59 : vector<1x32xf32> to vector<16x32xf32>
    %81 = arith.mulf %79, %80 : vector<16x32xf32>
    %82 = vector.broadcast %61 : vector<1x32xf32> to vector<16x32xf32>
    %83 = arith.addf %81, %82 : vector<16x32xf32>
    %c0_36 = arith.constant 0 : index
    %c0_37 = arith.constant 0 : index
    %c0_38 = arith.constant 0 : index
    %84 = vector.load %arg7[%c0_36, %c0_37, %c0_38] : memref<2x32x32xf32, #tpu.memory_space<vmem>>, vector<1x32x32xf32>
    %85 = vector.shape_cast %84 : vector<1x32x32xf32> to vector<32x32xf32>
    %cst_39 = arith.constant dense<0.000000e+00> : vector<16x32xf32>
    %86 = tpu.matmul %83, %85, %cst_39 {dimension_numbers = #tpu.dot_dimension_numbers<[1], [0], [0], [1], [0, 0, 1, 1], [], []>} : vector<16x32xf32>, vector<32x32xf32>, vector<16x32xf32> -> vector<16x32xf32>
    %c0_40 = arith.constant 0 : index
    %c0_41 = arith.constant 0 : index
    %c0_42 = arith.constant 0 : index
    %87 = vector.load %arg8[%c0_40, %c0_41, %c0_42] : memref<2x1x32xf32, #tpu.memory_space<vmem>>, vector<1x1x32xf32>
    %88 = vector.shape_cast %87 : vector<1x1x32xf32> to vector<1x32xf32>
    %89 = vector.broadcast %88 : vector<1x32xf32> to vector<16x32xf32>
    %90 = arith.addf %86, %89 : vector<16x32xf32>
    %cst_43 = arith.constant 0.000000e+00 : f32
    %91 = vector.broadcast %cst_43 : f32 to vector<16x32xf32>
    %92 = arith.maximumf %90, %91 : vector<16x32xf32>
    %c0_44 = arith.constant 0 : index
    %c0_45 = arith.constant 0 : index
    %c0_46 = arith.constant 0 : index
    %93 = vector.load %arg9[%c0_44, %c0_45, %c0_46] : memref<2x32x32xf32, #tpu.memory_space<vmem>>, vector<1x32x32xf32>
    %94 = vector.shape_cast %93 : vector<1x32x32xf32> to vector<32x32xf32>
    %cst_47 = arith.constant dense<0.000000e+00> : vector<16x32xf32>
    %95 = tpu.matmul %92, %94, %cst_47 {dimension_numbers = #tpu.dot_dimension_numbers<[1], [0], [0], [1], [0, 0, 1, 1], [], []>} : vector<16x32xf32>, vector<32x32xf32>, vector<16x32xf32> -> vector<16x32xf32>
    %c0_48 = arith.constant 0 : index
    %c0_49 = arith.constant 0 : index
    %c0_50 = arith.constant 0 : index
    %96 = vector.load %arg10[%c0_48, %c0_49, %c0_50] : memref<2x1x32xf32, #tpu.memory_space<vmem>>, vector<1x1x32xf32>
    %97 = vector.shape_cast %96 : vector<1x1x32xf32> to vector<1x32xf32>
    %98 = vector.broadcast %97 : vector<1x32xf32> to vector<16x32xf32>
    %99 = arith.addf %95, %98 : vector<16x32xf32>
    %100 = arith.addf %99, %83 : vector<16x32xf32>
    %c0_51 = arith.constant 0 : index
    %c0_52 = arith.constant 0 : index
    %c0_53 = arith.constant 0 : index
    %101 = vector.load %arg11[%c0_51, %c0_52, %c0_53] : memref<2x1x32xf32, #tpu.memory_space<vmem>>, vector<1x1x32xf32>
    %102 = vector.shape_cast %101 : vector<1x1x32xf32> to vector<1x32xf32>
    %c0_54 = arith.constant 0 : index
    %c0_55 = arith.constant 0 : index
    %c0_56 = arith.constant 0 : index
    %103 = vector.load %arg12[%c0_54, %c0_55, %c0_56] : memref<2x1x32xf32, #tpu.memory_space<vmem>>, vector<1x1x32xf32>
    %104 = vector.shape_cast %103 : vector<1x1x32xf32> to vector<1x32xf32>
    %cst_57 = arith.constant dense<0.000000e+00> : vector<16xf32>
    %105 = vector.multi_reduction <add>, %100, %cst_57 [1] : vector<16x32xf32> to vector<16xf32>
    %106 = vector.shape_cast %105 : vector<16xf32> to vector<16x1xf32>
    %cst_58 = arith.constant 3.200000e+01 : f32
    %107 = vector.broadcast %cst_58 : f32 to vector<16x1xf32>
    %108 = arith.divf %106, %107 : vector<16x1xf32>
    %109 = vector.broadcast %108 : vector<16x1xf32> to vector<16x32xf32>
    %110 = arith.subf %100, %109 : vector<16x32xf32>
    %111 = arith.mulf %110, %110 : vector<16x32xf32>
    %cst_59 = arith.constant dense<0.000000e+00> : vector<16xf32>
    %112 = vector.multi_reduction <add>, %111, %cst_59 [1] : vector<16x32xf32> to vector<16xf32>
    %113 = vector.shape_cast %112 : vector<16xf32> to vector<16x1xf32>
    %cst_60 = arith.constant 3.200000e+01 : f32
    %114 = vector.broadcast %cst_60 : f32 to vector<16x1xf32>
    %115 = arith.divf %113, %114 : vector<16x1xf32>
    %116 = vector.broadcast %108 : vector<16x1xf32> to vector<16x32xf32>
    %117 = arith.subf %100, %116 : vector<16x32xf32>
    %cst_61 = arith.constant 9.99999974E-6 : f32
    %118 = vector.broadcast %cst_61 : f32 to vector<16x1xf32>
    %119 = arith.addf %115, %118 : vector<16x1xf32>
    %120 = math.rsqrt %119 : vector<16x1xf32>
    %121 = vector.broadcast %120 : vector<16x1xf32> to vector<16x32xf32>
    %122 = arith.mulf %117, %121 : vector<16x32xf32>
    %123 = vector.broadcast %102 : vector<1x32xf32> to vector<16x32xf32>
    %124 = arith.mulf %122, %123 : vector<16x32xf32>
    %125 = vector.broadcast %104 : vector<1x32xf32> to vector<16x32xf32>
    %126 = arith.addf %124, %125 : vector<16x32xf32>
    %c1 = arith.constant 1 : index
    %c0_62 = arith.constant 0 : index
    %c0_63 = arith.constant 0 : index
    %127 = vector.load %arg1[%c1, %c0_62, %c0_63] : memref<2x32x192xf32, #tpu.memory_space<vmem>>, vector<1x32x192xf32>
    %128 = vector.shape_cast %127 : vector<1x32x192xf32> to vector<32x192xf32>
    %cst_64 = arith.constant dense<0.000000e+00> : vector<16x192xf32>
    %129 = tpu.matmul %126, %128, %cst_64 {dimension_numbers = #tpu.dot_dimension_numbers<[1], [0], [0], [1], [0, 0, 1, 1], [], []>} : vector<16x32xf32>, vector<32x192xf32>, vector<16x192xf32> -> vector<16x192xf32>
    %c1_65 = arith.constant 1 : index
    %c0_66 = arith.constant 0 : index
    %c0_67 = arith.constant 0 : index
    %130 = vector.load %arg2[%c1_65, %c0_66, %c0_67] : memref<2x1x192xf32, #tpu.memory_space<vmem>>, vector<1x1x192xf32>
    %131 = vector.shape_cast %130 : vector<1x1x192xf32> to vector<1x192xf32>
    %132 = vector.broadcast %131 : vector<1x192xf32> to vector<16x192xf32>
    %133 = arith.addf %129, %132 : vector<16x192xf32>
    %134 = vector.extract_strided_slice %133 {offsets = [0, 0], sizes = [16, 32], strides = [1, 1]} : vector<16x192xf32> to vector<16x32xf32>
    %135 = vector.shape_cast %134 : vector<16x32xf32> to vector<2x8x32xf32>
    %136 = vector.extract_strided_slice %133 {offsets = [0, 64], sizes = [16, 32], strides = [1, 1]} : vector<16x192xf32> to vector<16x32xf32>
    %137 = vector.shape_cast %136 : vector<16x32xf32> to vector<2x8x32xf32>
    %138 = vector.extract_strided_slice %133 {offsets = [0, 128], sizes = [16, 32], strides = [1, 1]} : vector<16x192xf32> to vector<16x32xf32>
    %139 = vector.shape_cast %138 : vector<16x32xf32> to vector<2x8x32xf32>
    "tpu.trace_start"() <{level = 10 : i32, message = "ntd,nsd->nts"}> : () -> ()
    %cst_68 = arith.constant dense<0.000000e+00> : vector<2x8x8xf32>
    %140 = tpu.matmul %135, %137, %cst_68 {dimension_numbers = #tpu.dot_dimension_numbers<[2], [2], [1], [1], [0, 0, 0, 1, 1, 1], [0], [0]>} : vector<2x8x32xf32>, vector<2x8x32xf32>, vector<2x8x8xf32> -> vector<2x8x8xf32>
    "tpu.trace_stop"() : () -> ()
    %cst_69 = arith.constant 0.176776692 : f32
    %141 = vector.broadcast %cst_69 : f32 to vector<2x8x8xf32>
    %142 = arith.mulf %140, %141 : vector<2x8x8xf32>
    %cst_70 = arith.constant dense<0xFF800000> : vector<2x8xf32>
    %143 = vector.multi_reduction <maximumf>, %142, %cst_70 [2] : vector<2x8x8xf32> to vector<2x8xf32>
    %144 = vector.shape_cast %143 : vector<2x8xf32> to vector<2x8x1xf32>
    %145 = vector.broadcast %144 : vector<2x8x1xf32> to vector<2x8x8xf32>
    %146 = arith.subf %142, %145 : vector<2x8x8xf32>
    %147 = math.exp %146 : vector<2x8x8xf32>
    %cst_71 = arith.constant dense<0.000000e+00> : vector<2x8xf32>
    %148 = vector.multi_reduction <add>, %147, %cst_71 [2] : vector<2x8x8xf32> to vector<2x8xf32>
    %149 = vector.shape_cast %148 : vector<2x8xf32> to vector<2x8x1xf32>
    %150 = vector.broadcast %149 : vector<2x8x1xf32> to vector<2x8x8xf32>
    %151 = arith.divf %147, %150 : vector<2x8x8xf32>
    "tpu.trace_start"() <{level = 10 : i32, message = "nts,nsd->ntd"}> : () -> ()
    %cst_72 = arith.constant dense<0.000000e+00> : vector<2x8x32xf32>
    %152 = tpu.matmul %151, %139, %cst_72 {dimension_numbers = #tpu.dot_dimension_numbers<[2], [1], [1], [2], [0, 0, 0, 1, 1, 2], [0], [0]>} : vector<2x8x8xf32>, vector<2x8x32xf32>, vector<2x8x32xf32> -> vector<2x8x32xf32>
    "tpu.trace_stop"() : () -> ()
    %153 = vector.shape_cast %152 : vector<2x8x32xf32> to vector<16x32xf32>
    %154 = vector.extract_strided_slice %133 {offsets = [0, 32], sizes = [16, 32], strides = [1, 1]} : vector<16x192xf32> to vector<16x32xf32>
    %155 = vector.shape_cast %154 : vector<16x32xf32> to vector<2x8x32xf32>
    %156 = vector.extract_strided_slice %133 {offsets = [0, 96], sizes = [16, 32], strides = [1, 1]} : vector<16x192xf32> to vector<16x32xf32>
    %157 = vector.shape_cast %156 : vector<16x32xf32> to vector<2x8x32xf32>
    %158 = vector.extract_strided_slice %133 {offsets = [0, 160], sizes = [16, 32], strides = [1, 1]} : vector<16x192xf32> to vector<16x32xf32>
    %159 = vector.shape_cast %158 : vector<16x32xf32> to vector<2x8x32xf32>
    "tpu.trace_start"() <{level = 10 : i32, message = "ntd,nsd->nts"}> : () -> ()
    %cst_73 = arith.constant dense<0.000000e+00> : vector<2x8x8xf32>
    %160 = tpu.matmul %155, %157, %cst_73 {dimension_numbers = #tpu.dot_dimension_numbers<[2], [2], [1], [1], [0, 0, 0, 1, 1, 1], [0], [0]>} : vector<2x8x32xf32>, vector<2x8x32xf32>, vector<2x8x8xf32> -> vector<2x8x8xf32>
    "tpu.trace_stop"() : () -> ()
    %cst_74 = arith.constant 0.176776692 : f32
    %161 = vector.broadcast %cst_74 : f32 to vector<2x8x8xf32>
    %162 = arith.mulf %160, %161 : vector<2x8x8xf32>
    %cst_75 = arith.constant dense<0xFF800000> : vector<2x8xf32>
    %163 = vector.multi_reduction <maximumf>, %162, %cst_75 [2] : vector<2x8x8xf32> to vector<2x8xf32>
    %164 = vector.shape_cast %163 : vector<2x8xf32> to vector<2x8x1xf32>
    %165 = vector.broadcast %164 : vector<2x8x1xf32> to vector<2x8x8xf32>
    %166 = arith.subf %162, %165 : vector<2x8x8xf32>
    %167 = math.exp %166 : vector<2x8x8xf32>
    %cst_76 = arith.constant dense<0.000000e+00> : vector<2x8xf32>
    %168 = vector.multi_reduction <add>, %167, %cst_76 [2] : vector<2x8x8xf32> to vector<2x8xf32>
    %169 = vector.shape_cast %168 : vector<2x8xf32> to vector<2x8x1xf32>
    %170 = vector.broadcast %169 : vector<2x8x1xf32> to vector<2x8x8xf32>
    %171 = arith.divf %167, %170 : vector<2x8x8xf32>
    "tpu.trace_start"() <{level = 10 : i32, message = "nts,nsd->ntd"}> : () -> ()
    %cst_77 = arith.constant dense<0.000000e+00> : vector<2x8x32xf32>
    %172 = tpu.matmul %171, %159, %cst_77 {dimension_numbers = #tpu.dot_dimension_numbers<[2], [1], [1], [2], [0, 0, 0, 1, 1, 2], [0], [0]>} : vector<2x8x8xf32>, vector<2x8x32xf32>, vector<2x8x32xf32> -> vector<2x8x32xf32>
    "tpu.trace_stop"() : () -> ()
    %173 = vector.shape_cast %172 : vector<2x8x32xf32> to vector<16x32xf32>
    %174 = tpu.concatenate %153, %173 in 1 : vector<16x32xf32>, vector<16x32xf32> -> vector<16x64xf32>
    %c1_78 = arith.constant 1 : index
    %c0_79 = arith.constant 0 : index
    %c0_80 = arith.constant 0 : index
    %175 = vector.load %arg3[%c1_78, %c0_79, %c0_80] : memref<2x64x32xf32, #tpu.memory_space<vmem>>, vector<1x64x32xf32>
    %176 = vector.shape_cast %175 : vector<1x64x32xf32> to vector<64x32xf32>
    %cst_81 = arith.constant dense<0.000000e+00> : vector<16x32xf32>
    %177 = tpu.matmul %174, %176, %cst_81 {dimension_numbers = #tpu.dot_dimension_numbers<[1], [0], [0], [1], [0, 0, 1, 1], [], []>} : vector<16x64xf32>, vector<64x32xf32>, vector<16x32xf32> -> vector<16x32xf32>
    %c1_82 = arith.constant 1 : index
    %c0_83 = arith.constant 0 : index
    %c0_84 = arith.constant 0 : index
    %178 = vector.load %arg4[%c1_82, %c0_83, %c0_84] : memref<2x1x32xf32, #tpu.memory_space<vmem>>, vector<1x1x32xf32>
    %179 = vector.shape_cast %178 : vector<1x1x32xf32> to vector<1x32xf32>
    %180 = vector.broadcast %179 : vector<1x32xf32> to vector<16x32xf32>
    %181 = arith.addf %177, %180 : vector<16x32xf32>
    %182 = arith.addf %181, %126 : vector<16x32xf32>
    %c1_85 = arith.constant 1 : index
    %c0_86 = arith.constant 0 : index
    %c0_87 = arith.constant 0 : index
    %183 = vector.load %arg5[%c1_85, %c0_86, %c0_87] : memref<2x1x32xf32, #tpu.memory_space<vmem>>, vector<1x1x32xf32>
    %184 = vector.shape_cast %183 : vector<1x1x32xf32> to vector<1x32xf32>
    %c1_88 = arith.constant 1 : index
    %c0_89 = arith.constant 0 : index
    %c0_90 = arith.constant 0 : index
    %185 = vector.load %arg6[%c1_88, %c0_89, %c0_90] : memref<2x1x32xf32, #tpu.memory_space<vmem>>, vector<1x1x32xf32>
    %186 = vector.shape_cast %185 : vector<1x1x32xf32> to vector<1x32xf32>
    %cst_91 = arith.constant dense<0.000000e+00> : vector<16xf32>
    %187 = vector.multi_reduction <add>, %182, %cst_91 [1] : vector<16x32xf32> to vector<16xf32>
    %188 = vector.shape_cast %187 : vector<16xf32> to vector<16x1xf32>
    %cst_92 = arith.constant 3.200000e+01 : f32
    %189 = vector.broadcast %cst_92 : f32 to vector<16x1xf32>
    %190 = arith.divf %188, %189 : vector<16x1xf32>
    %191 = vector.broadcast %190 : vector<16x1xf32> to vector<16x32xf32>
    %192 = arith.subf %182, %191 : vector<16x32xf32>
    %193 = arith.mulf %192, %192 : vector<16x32xf32>
    %cst_93 = arith.constant dense<0.000000e+00> : vector<16xf32>
    %194 = vector.multi_reduction <add>, %193, %cst_93 [1] : vector<16x32xf32> to vector<16xf32>
    %195 = vector.shape_cast %194 : vector<16xf32> to vector<16x1xf32>
    %cst_94 = arith.constant 3.200000e+01 : f32
    %196 = vector.broadcast %cst_94 : f32 to vector<16x1xf32>
    %197 = arith.divf %195, %196 : vector<16x1xf32>
    %198 = vector.broadcast %190 : vector<16x1xf32> to vector<16x32xf32>
    %199 = arith.subf %182, %198 : vector<16x32xf32>
    %cst_95 = arith.constant 9.99999974E-6 : f32
    %200 = vector.broadcast %cst_95 : f32 to vector<16x1xf32>
    %201 = arith.addf %197, %200 : vector<16x1xf32>
    %202 = math.rsqrt %201 : vector<16x1xf32>
    %203 = vector.broadcast %202 : vector<16x1xf32> to vector<16x32xf32>
    %204 = arith.mulf %199, %203 : vector<16x32xf32>
    %205 = vector.broadcast %184 : vector<1x32xf32> to vector<16x32xf32>
    %206 = arith.mulf %204, %205 : vector<16x32xf32>
    %207 = vector.broadcast %186 : vector<1x32xf32> to vector<16x32xf32>
    %208 = arith.addf %206, %207 : vector<16x32xf32>
    %c1_96 = arith.constant 1 : index
    %c0_97 = arith.constant 0 : index
    %c0_98 = arith.constant 0 : index
    %209 = vector.load %arg7[%c1_96, %c0_97, %c0_98] : memref<2x32x32xf32, #tpu.memory_space<vmem>>, vector<1x32x32xf32>
    %210 = vector.shape_cast %209 : vector<1x32x32xf32> to vector<32x32xf32>
    %cst_99 = arith.constant dense<0.000000e+00> : vector<16x32xf32>
    %211 = tpu.matmul %208, %210, %cst_99 {dimension_numbers = #tpu.dot_dimension_numbers<[1], [0], [0], [1], [0, 0, 1, 1], [], []>} : vector<16x32xf32>, vector<32x32xf32>, vector<16x32xf32> -> vector<16x32xf32>
    %c1_100 = arith.constant 1 : index
    %c0_101 = arith.constant 0 : index
    %c0_102 = arith.constant 0 : index
    %212 = vector.load %arg8[%c1_100, %c0_101, %c0_102] : memref<2x1x32xf32, #tpu.memory_space<vmem>>, vector<1x1x32xf32>
    %213 = vector.shape_cast %212 : vector<1x1x32xf32> to vector<1x32xf32>
    %214 = vector.broadcast %213 : vector<1x32xf32> to vector<16x32xf32>
    %215 = arith.addf %211, %214 : vector<16x32xf32>
    %cst_103 = arith.constant 0.000000e+00 : f32
    %216 = vector.broadcast %cst_103 : f32 to vector<16x32xf32>
    %217 = arith.maximumf %215, %216 : vector<16x32xf32>
    %c1_104 = arith.constant 1 : index
    %c0_105 = arith.constant 0 : index
    %c0_106 = arith.constant 0 : index
    %218 = vector.load %arg9[%c1_104, %c0_105, %c0_106] : memref<2x32x32xf32, #tpu.memory_space<vmem>>, vector<1x32x32xf32>
    %219 = vector.shape_cast %218 : vector<1x32x32xf32> to vector<32x32xf32>
    %cst_107 = arith.constant dense<0.000000e+00> : vector<16x32xf32>
    %220 = tpu.matmul %217, %219, %cst_107 {dimension_numbers = #tpu.dot_dimension_numbers<[1], [0], [0], [1], [0, 0, 1, 1], [], []>} : vector<16x32xf32>, vector<32x32xf32>, vector<16x32xf32> -> vector<16x32xf32>
    %c1_108 = arith.constant 1 : index
    %c0_109 = arith.constant 0 : index
    %c0_110 = arith.constant 0 : index
    %221 = vector.load %arg10[%c1_108, %c0_109, %c0_110] : memref<2x1x32xf32, #tpu.memory_space<vmem>>, vector<1x1x32xf32>
    %222 = vector.shape_cast %221 : vector<1x1x32xf32> to vector<1x32xf32>
    %223 = vector.broadcast %222 : vector<1x32xf32> to vector<16x32xf32>
    %224 = arith.addf %220, %223 : vector<16x32xf32>
    %225 = arith.addf %224, %208 : vector<16x32xf32>
    %c1_111 = arith.constant 1 : index
    %c0_112 = arith.constant 0 : index
    %c0_113 = arith.constant 0 : index
    %226 = vector.load %arg11[%c1_111, %c0_112, %c0_113] : memref<2x1x32xf32, #tpu.memory_space<vmem>>, vector<1x1x32xf32>
    %227 = vector.shape_cast %226 : vector<1x1x32xf32> to vector<1x32xf32>
    %c1_114 = arith.constant 1 : index
    %c0_115 = arith.constant 0 : index
    %c0_116 = arith.constant 0 : index
    %228 = vector.load %arg12[%c1_114, %c0_115, %c0_116] : memref<2x1x32xf32, #tpu.memory_space<vmem>>, vector<1x1x32xf32>
    %229 = vector.shape_cast %228 : vector<1x1x32xf32> to vector<1x32xf32>
    %cst_117 = arith.constant dense<0.000000e+00> : vector<16xf32>
    %230 = vector.multi_reduction <add>, %225, %cst_117 [1] : vector<16x32xf32> to vector<16xf32>
    %231 = vector.shape_cast %230 : vector<16xf32> to vector<16x1xf32>
    %cst_118 = arith.constant 3.200000e+01 : f32
    %232 = vector.broadcast %cst_118 : f32 to vector<16x1xf32>
    %233 = arith.divf %231, %232 : vector<16x1xf32>
    %234 = vector.broadcast %233 : vector<16x1xf32> to vector<16x32xf32>
    %235 = arith.subf %225, %234 : vector<16x32xf32>
    %236 = arith.mulf %235, %235 : vector<16x32xf32>
    %cst_119 = arith.constant dense<0.000000e+00> : vector<16xf32>
    %237 = vector.multi_reduction <add>, %236, %cst_119 [1] : vector<16x32xf32> to vector<16xf32>
    %238 = vector.shape_cast %237 : vector<16xf32> to vector<16x1xf32>
    %cst_120 = arith.constant 3.200000e+01 : f32
    %239 = vector.broadcast %cst_120 : f32 to vector<16x1xf32>
    %240 = arith.divf %238, %239 : vector<16x1xf32>
    %241 = vector.broadcast %233 : vector<16x1xf32> to vector<16x32xf32>
    %242 = arith.subf %225, %241 : vector<16x32xf32>
    %cst_121 = arith.constant 9.99999974E-6 : f32
    %243 = vector.broadcast %cst_121 : f32 to vector<16x1xf32>
    %244 = arith.addf %240, %243 : vector<16x1xf32>
    %245 = math.rsqrt %244 : vector<16x1xf32>
    %246 = vector.broadcast %245 : vector<16x1xf32> to vector<16x32xf32>
    %247 = arith.mulf %242, %246 : vector<16x32xf32>
    %248 = vector.broadcast %227 : vector<1x32xf32> to vector<16x32xf32>
    %249 = arith.mulf %247, %248 : vector<16x32xf32>
    %250 = vector.broadcast %229 : vector<1x32xf32> to vector<16x32xf32>
    %251 = arith.addf %249, %250 : vector<16x32xf32>
    %252 = vector.shape_cast %251 : vector<16x32xf32> to vector<2x8x32xf32>
    %253 = vector.extract_strided_slice %252 {offsets = [0, 0, 0], sizes = [2, 1, 32], strides = [1, 1, 1]} : vector<2x8x32xf32> to vector<2x1x32xf32>
    %254 = vector.shape_cast %253 : vector<2x1x32xf32> to vector<2x32xf32>
    %255 = vector.extract_strided_slice %252 {offsets = [0, 1, 0], sizes = [2, 1, 32], strides = [1, 1, 1]} : vector<2x8x32xf32> to vector<2x1x32xf32>
    %256 = vector.shape_cast %255 : vector<2x1x32xf32> to vector<2x32xf32>
    %257 = vector.extract_strided_slice %252 {offsets = [0, 2, 0], sizes = [2, 1, 32], strides = [1, 1, 1]} : vector<2x8x32xf32> to vector<2x1x32xf32>
    %258 = vector.shape_cast %257 : vector<2x1x32xf32> to vector<2x32xf32>
    %259 = vector.extract_strided_slice %252 {offsets = [0, 3, 0], sizes = [2, 1, 32], strides = [1, 1, 1]} : vector<2x8x32xf32> to vector<2x1x32xf32>
    %260 = vector.shape_cast %259 : vector<2x1x32xf32> to vector<2x32xf32>
    %261 = vector.extract_strided_slice %252 {offsets = [0, 4, 0], sizes = [2, 1, 32], strides = [1, 1, 1]} : vector<2x8x32xf32> to vector<2x1x32xf32>
    %262 = vector.shape_cast %261 : vector<2x1x32xf32> to vector<2x32xf32>
    %263 = vector.extract_strided_slice %252 {offsets = [0, 5, 0], sizes = [2, 1, 32], strides = [1, 1, 1]} : vector<2x8x32xf32> to vector<2x1x32xf32>
    %264 = vector.shape_cast %263 : vector<2x1x32xf32> to vector<2x32xf32>
    %265 = vector.extract_strided_slice %252 {offsets = [0, 6, 0], sizes = [2, 1, 32], strides = [1, 1, 1]} : vector<2x8x32xf32> to vector<2x1x32xf32>
    %266 = vector.shape_cast %265 : vector<2x1x32xf32> to vector<2x32xf32>
    %267 = vector.extract_strided_slice %252 {offsets = [0, 7, 0], sizes = [2, 1, 32], strides = [1, 1, 1]} : vector<2x8x32xf32> to vector<2x1x32xf32>
    %268 = vector.shape_cast %267 : vector<2x1x32xf32> to vector<2x32xf32>
    %269 = tpu.concatenate %254, %256, %258, %260, %262, %264, %266, %268 in 1 : vector<2x32xf32>, vector<2x32xf32>, vector<2x32xf32>, vector<2x32xf32>, vector<2x32xf32>, vector<2x32xf32>, vector<2x32xf32>, vector<2x32xf32> -> vector<2x256xf32>
    %c0_122 = arith.constant 0 : index
    %c0_123 = arith.constant 0 : index
    %270 = vector.load %arg13[%c0_122, %c0_123] : memref<256x384xf32, #tpu.memory_space<vmem>>, vector<256x384xf32>
    %cst_124 = arith.constant dense<0.000000e+00> : vector<2x384xf32>
    %271 = tpu.matmul %269, %270, %cst_124 {dimension_numbers = #tpu.dot_dimension_numbers<[1], [0], [0], [1], [0, 0, 1, 1], [], []>} : vector<2x256xf32>, vector<256x384xf32>, vector<2x384xf32> -> vector<2x384xf32>
    %c0_125 = arith.constant 0 : index
    %c0_126 = arith.constant 0 : index
    %272 = vector.load %arg14[%c0_125, %c0_126] : memref<1x384xf32, #tpu.memory_space<vmem>>, vector<1x384xf32>
    %273 = vector.broadcast %272 : vector<1x384xf32> to vector<2x384xf32>
    %274 = arith.addf %271, %273 : vector<2x384xf32>
    %c0_127 = arith.constant 0 : index
    %c0_128 = arith.constant 0 : index
    %275 = vector.load %arg15[%c0_127, %c0_128] : memref<2x384xf32, #tpu.memory_space<vmem>>, vector<2x384xf32>
    tpu.vector_store %arg15[%c0_127, %c0_128], %274 {strides = array<i32>} : memref<2x384xf32, #tpu.memory_space<vmem>>, vector<2x384xf32>,
    return
  }
}

</mosaic_0001>

<bundles_post_ra>
// kernel: embedding_self_att_forward.1
= control target key start
LH: loop header
LB: loop body
LE: loop exit
PB: predicated region body
PF: predicated region fallthrough
CT: control target
= control target key end

     0   :  { %v3329_v7 = vmov 0.0   ;;  %s4150_s0 = inlined_call_operand.vmem [shape: f32[2,8,32], index: 0, kind: input, shape index: {}]   ;;  %s4151_s1 = inlined_call_operand.vmem [shape: f32[2,32,192], index: 1, kind: input, shape index: {}]   ;;  %s4152_s2 = inlined_call_operand.vmem [shape: f32[2,1,192], index: 2, kind: input, shape index: {}]   ;;  %s4153_s3 = inlined_call_operand.vmem [shape: f32[2,64,32], index: 3, kind: input, shape index: {}]   ;;  %s4154_s4 = inlined_call_operand.vmem [shape: f32[2,1,32], index: 4, kind: input, shape index: {}]   ;;  %s4155_s5 = inlined_call_operand.vmem [shape: f32[2,1,32], index: 5, kind: input, shape index: {}]   ;;  %s4156_s6 = inlined_call_operand.vmem [shape: f32[2,1,32], index: 6, kind: input, shape index: {}]   ;;  %s4157_s7 = inlined_call_operand.vmem [shape: f32[2,32,32], index: 7, kind: input, shape index: {}]   ;;  %s4158_s8 = inlined_call_operand.vmem [shape: f32[2,1,32], index: 8, kind: input, shape index: {}]   ;;  %s4159_s9 = inlined_call_operand.vmem [shape: f32[2,32,32], index: 9, kind: input, shape index: {}]   ;;  %s4160_s10 = inlined_call_operand.vmem [shape: f32[2,1,32], index: 10, kind: input, shape index: {}]   ;;  %s4161_s11 = inlined_call_operand.vmem [shape: f32[2,1,32], index: 11, kind: input, shape index: {}]   ;;  %s4162_s12 = inlined_call_operand.vmem [shape: f32[2,1,32], index: 12, kind: input, shape index: {}]   ;;  %s4163_s13 = inlined_call_operand.vmem [shape: f32[256,384], index: 13, kind: input, shape index: {}]   ;;  %s4164_s14 = inlined_call_operand.vmem [shape: f32[1,384], index: 14, kind: input, shape index: {}]   ;;  %s4165_s15 = inlined_call_operand.hbm [shape: f32[2,384], index: 15, kind: output, shape index: {}]  }
   0x1   :  { %v54_v0 = vld [vmem:[%s4151_s1 + $0x8] sm:$0xff]  ;;  %v56_v1 = vld [vmem:[%s4151_s1 + $0x18] sm:$0xff]  ;;  %v53_v2 = vld [vmem:[%s4151_s1] sm:$0xff]  ;;  %144 = vmatprep.mubr.f32.mxu0 %v3329_v7  ;;  %2897 = vmatprep.subr.mxu1 %v3329_v7 }
   0x2   :  { %v3059_v3 = vpack.c.bf16 %v56_v1, %v54_v0  ;;  %v55_v4 = vld [vmem:[%s4151_s1 + $0x10] sm:$0xff]  ;;  %v58_v5 = vld [vmem:[%s4151_s1 + $0x28] sm:$0xff]  ;;  %v60_v6 = vld [vmem:[%s4151_s1 + $0x38] sm:$0xff] }
   0x3   :  { %v3061_v8 = vpack.c.bf16 %v55_v4, %v53_v2  ;;  %v3063_v9 = vpack.c.bf16 %v60_v6, %v58_v5  ;;  %v57_v10 = vld [vmem:[%s4151_s1 + $0x20] sm:$0xff]  ;;  %v59_v11 = vld [vmem:[%s4151_s1 + $0x30] sm:$0xff] }
   0x4   :  { %3060 = vmatprep.subr.bf16.mxu0 %v3059_v3 }
   0x5   :  { %20 = vsyncpa [#allocation3], 0  ;;  %3062 = vmatpush1.bf16.msra.mxu0 %v3061_v8  ;;  %v3065_v12 = vpack.c.bf16 %v59_v11, %v57_v10  ;;  %v3445_v13 = vld [vmem:[%s4150_s0] sm:$0xff]  ;;  %vm73_vm0 = vcmask 261120   ;;  %v3454_v14 = vld [vmem:[%s4150_s0 + $0x8] sm:$0xff]  ;;  %v63_v15 = vlaneseq  ;;  %vm3330_vm1 = vmmov 0  }
   0x6   :  { %3064 = vmatprep.subr.bf16.mxu0 %v3063_v9  ;;  %2899 = vmatprep.mubr.msk.f32.mxu1 %vm3330_vm1, %v3329_v7  ;;  %v61_v18 = vld [vmem:[%s4152_s2] sm:$0x3]  ;;  %s3331_s0 = smov 64   ;;  %vm313_vm2 = vcmask 64512   ;;  %s3332_s25 = smov 32   ;;  %vm841_vm3 = vcmask 523264  }
   0x7   :  { %v3458_v16 = vshrl.u32 %v63_v15, 7  ;;  %s3333_s26 = smov 96   ;;  %vm2362_vm4 = vcmask 1041409   ;;  %vm2406_vm5 = vcmask 785408  }
   0x9   :  { %3066 = vmatpush1.bf16.msra.mxu0 %v3065_v12  ;;  %v3465_v17 = vsub.s32 0, %v3458_v16  ;;  %v3471_v19 = vsub.s32 1, %v3458_v16 }
   0xa   :  { %2912 = vmatprep.subr.mxu0 %v3329_v7 }
   0xb   :  { %v66_v20 = vrot.slane %v61_v18, %v3465_v17  ;;  %v70_v21 = vrot.slane %v61_v18, %v3471_v19 }
   0xc   :  { %2700 = vmatmul.mubr.msk.f32.vlgmr.msra.gmra.mrb[0].mxu0 %vm73_vm0, %v3445_v13 }
   0xd   :  { %150 = vmatprep.mubr.f32.mxu0 %v3329_v7 }
  0x10   :  { %2701 = vmatmul.mubr.msk.f32.gmra.mrb[2].mxu0 %vm73_vm0, %v3454_v14 }
  0x11   :  { %2914 = vmatprep.mubr.msk.f32.mxu0 %vm3330_vm1, %v3329_v7 }
  0xdf   :  { %v146_v22 = vpop.f32.mrb[0].mxu0 }
  0xe0   :  { %v147_v23 = vadd.f32 %v146_v22, %v66_v20  ;;  %v148_v24 = vpop.f32.mrb[1].mxu0 }
  0xe1   :  { %v3475_v25 = vadd.f32 %v148_v24, %v70_v21 }
  0xe2   :  { %158 = vrot.lane.b32.xlu0 %v147_v23, %s3331_s0 }
  0xe3   :  { %v152_v26 = vpop.f32.mrb[2].mxu0 }
  0xe4   :  { %v153_v27 = vadd.f32 %v152_v26, %v66_v20  ;;  %v154_v28 = vpop.f32.mrb[3].mxu0 }
  0xe5   :  { %v3478_v29 = vadd.f32 %v154_v28, %v70_v21 }
  0xe6   :  { %235 = vrot.lane.b32.xlu0 %v153_v27, %s3331_s0 }
  0xe7   :  { %2913 = vmatpush3.msra.mxu0 %v3478_v29 }
  0xe8   :  { %2922 = vmatprep.subr.mxu0 %v3329_v7 }
 0x154   :  { %v159_v30 = vpop.permute.xlu0 %158 }
 0x155   :  { %2898 = vmatpush3.xpose.msk.msra.mxu1 %vm73_vm0, %v159_v30 }
 0x156   :  { %2902 = vmatprep.subr.mxu1 %v3329_v7 }
 0x158   :  { %2900 = vmatmul.mubr.msk.f32.vlgmr.msra.gmra.mrb[0].mxu1 %vm73_vm0, %v147_v23  ;;  %v236_v31 = vpop.permute.xlu0 %235 }
 0x159   :  { %2903 = vmatpush3.xpose.msk.msra.mxu1 %vm73_vm0, %v236_v31  ;;  %2904 = vmatprep.mubr.msk.f32.mxu1 %vm3330_vm1, %v3329_v7 }
 0x15a   :  { %2907 = vmatprep.subr.mxu1 %v3329_v7 }
 0x15c   :  { %2905 = vmatmul.mubr.msk.f32.vlgmr.msra.gmra.mrb[2].mxu1 %vm73_vm0, %v153_v27 }
 0x15d   :  { %2908 = vmatpush3.msra.mxu1 %v3475_v25  ;;  %2909 = vmatprep.mubr.msk.f32.mxu1 %vm3330_vm1, %v3329_v7 }
 0x15e   :  { %2917 = vmatprep.subr.mxu1 %v3329_v7 }
 0x22b   :  { %v230_v32 = vpop.f32.mrb[0].mxu1 }
 0x22c   :  { %v311_v33 = vmul.f32 0.17677669, %v230_v32  ;;  %v2901_v34 = vpop.f32.mrb[1].mxu1 }
 0x22d   :  { %v828_v34 = vld [vmem:[%s4153_s3 + $0x10] sm:$0xff] }
 0x22e   :  { %v314_v35 = vsel %vm313_vm2, %v311_v33, -inf }
 0x22f   :  { %315 = vmax.xlane.f32.xlu1 %v314_v35  ;;  %v307_v36 = vpop.f32.mrb[2].mxu1 }
 0x230   :  { %v312_v37 = vmul.f32 0.17677669, %v307_v36  ;;  %v2906_v38 = vpop.f32.mrb[3].mxu1  ;;  %v829_v36 = vld [vmem:[%s4153_s3 + $0x18] sm:$0xff] }
 0x231   :  { %v830_v38 = vld [vmem:[%s4153_s3 + $0x20] sm:$0xff] }
 0x232   :  { %v317_v39 = vsel %vm313_vm2, %v312_v37, -inf }
 0x233   :  { %318 = vmax.xlane.f32.xlu1 %v317_v39  ;;  %v831_v39 = vld [vmem:[%s4153_s3 + $0x28] sm:$0xff] }
 0x244   :  { %484 = vrot.lane.b32.xlu1 %v147_v23, %s3332_s25 }
 0x248   :  { %562 = vrot.lane.b32.xlu1 %v153_v27, %s3332_s25 }
 0x24c   :  { %482 = vrot.lane.b32.xlu1 %v147_v23, %s3333_s26 }
 0x2bc   :  { %v316_v40 = vpop.xlane.xlu1 %315 }
 0x2bd   :  { %v320_v41 = vsub.f32 %v311_v33, %v316_v40  ;;  %v826_v33 = vld [vmem:[%s4153_s3] sm:$0xff]  ;;  %v3075_v40 = vpack.c.bf16 %v831_v39, %v830_v38 }
 0x2be   :  { %v2719_v39 = vld [vmem:[%s4158_s8] ss:$0 sm:$0xff] }
 0x2bf   :  { %v322_v42 = vmul.f32 1.442695, %v320_v41  ;;  %v832_v41 = vld [vmem:[%s4153_s3 + $0x30] sm:$0xff] }
 0x2c0   :  { %v319_v43 = vpop.xlane.xlu1 %318 }
 0x2c1   :  { %3257 = vpow2.f32 %v322_v42  ;;  %v321_v44 = vsub.f32 %v312_v37, %v319_v43  ;;  %v3071_v37 = vpack.c.bf16 %v829_v36, %v828_v34  ;;  %v833_v42 = vld [vmem:[%s4153_s3 + $0x38] sm:$0xff]  ;;  %v1066_v36 = vld [vmem:[%s4159_s9 + $0x10] sm:$0xff] }
 0x2c2   :  { %v3079_v43 = vpack.c.bf16 %v833_v42, %v832_v41 }
 0x2c3   :  { %v324_v45 = vmul.f32 1.442695, %v321_v44 }
 0x2c4   :  { %v485_v50 = vpop.permute.xlu1 %484 }
 0x2c5   :  { %3259 = vpow2.f32 %v324_v45 }
 0x2c8   :  { %v563_v51 = vpop.permute.xlu1 %562 }
 0x2cb   :  { %v3258_v46 = vpop.eup %3257 }
 0x2cc   :  { %v326_v47 = vsel %vm313_vm2, %v3258_v46, 0.0  ;;  %v483_v52 = vpop.permute.xlu1 %482 }
 0x2cd   :  { %327 = vadd.xlane.f32.xlu0 %v326_v47 }
 0x2cf   :  { %v3260_v48 = vpop.eup %3259 }
 0x2d0   :  { %v329_v49 = vsel %vm313_vm2, %v3260_v48, 0.0 }
 0x2d1   :  { %330 = vadd.xlane.f32.xlu1 %v329_v49 }
 0x2e2   :  { %560 = vrot.lane.b32.xlu1 %v153_v27, %s3333_s26 }
 0x35a   :  { %v328_v53 = vpop.xlane.xlu0 %327 }
 0x35b   :  { %3261 = vrcp.f32 %v328_v53 }
 0x35e   :  { %v331_v54 = vpop.xlane.xlu1 %330 }
 0x35f   :  { %3263 = vrcp.f32 %v331_v54 }
 0x362   :  { %v561_v59 = vpop.permute.xlu1 %560 }
 0x365   :  { %v3262_v55 = vpop.eup %3261 }
 0x366   :  { %v333_v56 = vmul.f32 %v3262_v55, %v3258_v46 }
 0x368   :  { %2910 = vmatmul.mubr.msk.f32.vlgmr.msra.gmra.mrb[4].mxu1 %vm313_vm2, %v333_v56 }
 0x369   :  { %v3264_v57 = vpop.eup %3263  ;;  %2918 = vmatpush3.xpose.msk.msra.mxu1 %vm73_vm0, %v485_v50  ;;  %2919 = vmatprep.mubr.msk.f32.mxu1 %vm3330_vm1, %v3329_v7 }
 0x36a   :  { %v335_v58 = vmul.f32 %v3264_v57, %v3260_v48  ;;  %2927 = vmatprep.subr.mxu1 %v3329_v7 }
 0x36c   :  { %2915 = vmatmul.mubr.msk.f32.vlgmr.msra.gmra.mrb[4].mxu0 %vm313_vm2, %v335_v58  ;;  %2920 = vmatmul.mubr.msk.f32.vlgmr.msra.gmra.mrb[6].mxu1 %vm73_vm0, %v483_v52  ;;  %v2714_v52 = vld [vmem:[%s4154_s4] ss:$0 sm:$0xff] }
 0x36d   :  { %2923 = vmatpush3.xpose.msk.msra.mxu0 %vm73_vm0, %v563_v51  ;;  %2924 = vmatprep.mubr.msk.f32.mxu0 %vm3330_vm1, %v3329_v7 }
 0x36e   :  { %2932 = vmatprep.subr.mxu0 %v3329_v7  ;;  %2929 = vmatprep.mubr.msk.f32.mxu1 %vm3330_vm1, %v3329_v7 }
 0x370   :  { %2925 = vmatmul.mubr.msk.f32.vlgmr.msra.gmra.mrb[6].mxu0 %vm73_vm0, %v561_v59 }
 0x371   :  { %2934 = vmatprep.mubr.msk.f32.mxu0 %vm3330_vm1, %v3329_v7 }
 0x43b   :  { %v3519_v60 = vpop.f32.mrb[4].mxu1 }
 0x43c   :  { %v2911_v61 = vpop.f32.mrb[5].mxu1 }
 0x43f   :  { %v3521_v62 = vpop.f32.mrb[4].mxu0  ;;  %v556_v63 = vpop.f32.mrb[6].mxu1 }
 0x440   :  { %v638_v0 = vmul.f32 0.17677669, %v556_v63  ;;  %v2916_v1 = vpop.f32.mrb[5].mxu0  ;;  %v2921_v2 = vpop.f32.mrb[7].mxu1 }
 0x442   :  { %v640_v3 = vsel %vm313_vm2, %v638_v0, -inf }
 0x443   :  { %v634_v4 = vpop.f32.mrb[6].mxu0  ;;  %641 = vmax.xlane.f32.xlu0 %v640_v3 }
 0x444   :  { %v639_v5 = vmul.f32 0.17677669, %v634_v4  ;;  %v2926_v6 = vpop.f32.mrb[7].mxu0 }
 0x445   :  { %v971_v6 = vld [vmem:[%s4157_s7 + $0x8] sm:$0xff] }
 0x446   :  { %v643_v8 = vsel %vm313_vm2, %v639_v5, -inf }
 0x447   :  { %644 = vmax.xlane.f32.xlu1 %v643_v8 }
 0x459   :  { %663 = vrot.lane.b32.xlu0 %v3475_v25, %s3333_s26 }
 0x4d0   :  { %v642_v9 = vpop.xlane.xlu0 %641 }
 0x4d1   :  { %v646_v10 = vsub.f32 %v638_v0, %v642_v9  ;;  %v972_v9 = vld [vmem:[%s4157_s7 + $0x10] sm:$0xff] }
 0x4d3   :  { %v648_v11 = vmul.f32 1.442695, %v646_v10  ;;  %v973_v10 = vld [vmem:[%s4157_s7 + $0x18] sm:$0xff] }
 0x4d4   :  { %v645_v12 = vpop.xlane.xlu1 %644  ;;  %v664_v15 = vpop.permute.xlu0 %663 }
 0x4d5   :  { %3265 = vpow2.f32 %v648_v11  ;;  %v647_v18 = vsub.f32 %v639_v5, %v645_v12  ;;  %2928 = vmatpush3.msra.mxu1 %v664_v15  ;;  %v3087_v11 = vpack.c.bf16 %v973_v10, %v972_v9  ;;  %v1064_v12 = vld [vmem:[%s4159_s9] sm:$0xff]  ;;  %v1065_v15 = vld [vmem:[%s4159_s9 + $0x8] sm:$0xff]  ;;  %v2733_v10 = vld [vmem:[%s4151_s1 + $0x70] sm:$0xff] }
 0x4d7   :  { %v650_v20 = vmul.f32 1.442695, %v647_v18  ;;  %v3091_v18 = vpack.c.bf16 %v1065_v15, %v1064_v12 }
 0x4d9   :  { %3267 = vpow2.f32 %v650_v20 }
 0x4df   :  { %v3266_v21 = vpop.eup %3265 }
 0x4e0   :  { %v652_v22 = vsel %vm313_vm2, %v3266_v21, 0.0 }
 0x4e1   :  { %653 = vadd.xlane.f32.xlu0 %v652_v22 }
 0x4e3   :  { %v3268_v23 = vpop.eup %3267 }
 0x4e4   :  { %v655_v24 = vsel %vm313_vm2, %v3268_v23, 0.0 }
 0x4e5   :  { %656 = vadd.xlane.f32.xlu0 %v655_v24 }
 0x4fb   :  { %740 = vrot.lane.b32.xlu0 %v3478_v29, %s3333_s26  ;;  %v827_v29 = vld [vmem:[%s4153_s3 + $0x8] sm:$0xff] }
 0x4fc   :  { %v3067_v35 = vpack.c.bf16 %v827_v29, %v826_v33 }
 0x4fe   :  { %3068 = vmatprep.subr.bf16.mxu1 %v3067_v35 }
 0x56e   :  { %v654_v25 = vpop.xlane.xlu0 %653 }
 0x56f   :  { %3269 = vrcp.f32 %v654_v25 }
 0x572   :  { %v657_v26 = vpop.xlane.xlu0 %656 }
 0x573   :  { %3271 = vrcp.f32 %v657_v26 }
 0x576   :  { %v741_v27 = vpop.permute.xlu0 %740 }
 0x577   :  { %2933 = vmatpush3.msra.mxu0 %v741_v27  ;;  %v2717_v27 = vld [vmem:[%s4155_s5] ss:$0 sm:$0xff] }
 0x579   :  { %v3270_v28 = vpop.eup %3269 }
 0x57a   :  { %v659_v30 = vmul.f32 %v3270_v28, %v3266_v21 }
 0x57c   :  { %2930 = vmatmul.mubr.msk.f32.vlgmr.msra.gmra.mrb[8].mxu1 %vm313_vm2, %v659_v30  ;;  %v2718_v30 = vld [vmem:[%s4156_s6] ss:$0 sm:$0xff] }
 0x57d   :  { %v3272_v31 = vpop.eup %3271  ;;  %3070 = vmatpush3.bf16.msra.mxu1 %v3067_v35 }
 0x57e   :  { %v661_v32 = vmul.f32 %v3272_v31, %v3268_v23  ;;  %3072 = vmatprep.subr.bf16.mxu1 %v3071_v37 }
 0x580   :  { %2935 = vmatmul.mubr.msk.f32.vlgmr.msra.gmra.mrb[8].mxu0 %vm313_vm2, %v661_v32 }
 0x581   :  { %3074 = vmatpush3.bf16.msra.mxu1 %v3071_v37  ;;  %v1067_v37 = vld [vmem:[%s4159_s9 + $0x18] sm:$0xff] }
 0x582   :  { %3076 = vmatprep.subr.bf16.mxu1 %v3075_v40  ;;  %v3095_v38 = vpack.c.bf16 %v1067_v37, %v1066_v36 }
 0x585   :  { %3078 = vmatpush3.bf16.msra.mxu1 %v3075_v40 }
 0x586   :  { %3080 = vmatprep.subr.bf16.mxu1 %v3079_v43 }
 0x589   :  { %3082 = vmatpush3.bf16.msra.mxu1 %v3079_v43 }
 0x64f   :  { %v735_v44 = vpop.f32.mrb[8].mxu1 }
 0x650   :  { %818 = vrot.lane.b32.xlu0 %v735_v44, %s3332_s25  ;;  %v2931_v45 = vpop.f32.mrb[9].mxu1 }
 0x653   :  { %v812_v46 = vpop.f32.mrb[8].mxu0 }
 0x654   :  { %820 = vrot.lane.b32.xlu1 %v812_v46, %s3332_s25  ;;  %v2936_v47 = vpop.f32.mrb[9].mxu0  ;;  %v2722_v46 = vld [vmem:[%s4160_s10] ss:$0 sm:$0xff] }
 0x6c2   :  { %v819_v48 = vpop.permute.xlu0 %818 }
 0x6c3   :  { %v824_v49 = vsel %vm73_vm0, %v3519_v60, %v819_v48 }
 0x6c4   :  { %2953 = vmatprep.mubr.msk.f32.mxu1 %vm841_vm3, %v824_v49 }
 0x6c6   :  { %v821_v50 = vpop.permute.xlu1 %820 }
 0x6c7   :  { %v825_v51 = vsel %vm73_vm0, %v3521_v62, %v821_v50 }
 0x6c8   :  { %2954 = vmatmul.mubr.msk.f32.vlgmr.msra.gmra.mrb[10].mxu1 %vm841_vm3, %v825_v51 }
 0x6c9   :  { %1294 = vmatprep.mubr.f32.mxu1 %v3329_v7 }
 0x79b   :  { %v2955_v53 = vpop.f32.mrb[10].mxu1 }
 0x79c   :  { %v920_v54 = vadd.f32 %v2955_v53, %v2714_v52  ;;  %v914_v55 = vpop.f32.mrb[11].mxu1 }
 0x79d   :  { %v915_v56 = vadd.f32 %v2714_v52, %v914_v55 }
 0x79e   :  { %v924_v57 = vadd.f32 %v920_v54, %v3454_v14 }
 0x79f   :  { %v923_v58 = vadd.f32 %v915_v56, %v3445_v13  ;;  %v970_v13 = vld [vmem:[%s4157_s7] sm:$0xff] }
 0x7a0   :  { %v930_v59 = vsel %vm73_vm0, %v924_v57, 0.0  ;;  %v3083_v8 = vpack.c.bf16 %v971_v6, %v970_v13  ;;  %v2732_v13 = vld [vmem:[%s4151_s1 + $0x68] sm:$0xff]  ;;  %v2734_v6 = vld [vmem:[%s4151_s1 + $0x78] sm:$0xff] }
 0x7a1   :  { %931 = vadd.xlane.f32.xlu1 %v930_v59  ;;  %v927_v60 = vsel %vm73_vm0, %v923_v58, 0.0  ;;  %v3103_v9 = vpack.c.bf16 %v2734_v6, %v2732_v13 }
 0x7a2   :  { %928 = vadd.xlane.f32.xlu0 %v927_v60  ;;  %3084 = vmatprep.subr.bf16.mxu0 %v3083_v8 }
 0x7a3   :  { %3086 = vmatpush3.bf16.msra.mxu0 %v3083_v8  ;;  %v2731_v8 = vld [vmem:[%s4151_s1 + $0x60] sm:$0xff] }
 0x7a4   :  { %3088 = vmatprep.subr.bf16.mxu0 %v3087_v11 }
 0x7a7   :  { %3090 = vmatpush3.bf16.msra.mxu0 %v3087_v11  ;;  %v3105_v11 = vpack.c.bf16 %v2733_v10, %v2731_v8 }
 0x7a8   :  { %3092 = vmatprep.subr.bf16.mxu0 %v3091_v18 }
 0x82e   :  { %v932_v61 = vpop.xlane.xlu1 %931 }
 0x82f   :  { %v935_v62 = vmul.f32 0.03125, %v932_v61  ;;  %v929_v63 = vpop.xlane.xlu0 %928 }
 0x830   :  { %v934_v0 = vmul.f32 0.03125, %v929_v63 }
 0x831   :  { %v937_v1 = vsub.f32 %v924_v57, %v935_v62 }
 0x832   :  { %v936_v2 = vsub.f32 %v923_v58, %v934_v0 }
 0x833   :  { %v939_v5 = vmul.f32 %v937_v1, %v937_v1 }
 0x834   :  { %v938_v3 = vmul.f32 %v936_v2, %v936_v2 }
 0x835   :  { %v943_v14 = vsel %vm73_vm0, %v939_v5, 0.0  ;;  %v2729_v5 = vld [vmem:[%s4151_s1 + $0x50] sm:$0xff] }
 0x836   :  { %v940_v4 = vsel %vm73_vm0, %v938_v3, 0.0 }
 0x837   :  { %941 = vadd.xlane.f32.xlu0 %v940_v4  ;;  %v2727_v4 = vld [vmem:[%s4151_s1 + $0x40] sm:$0xff] }
 0x83b   :  { %944 = vadd.xlane.f32.xlu0 %v943_v14  ;;  %v3101_v14 = vpack.c.bf16 %v2729_v5, %v2727_v4 }
 0x8c4   :  { %v942_v20 = vpop.xlane.xlu0 %941 }
 0x8c5   :  { %v946_v21 = vmul.f32 0.03125, %v942_v20 }
 0x8c7   :  { %v948_v22 = vadd.f32 1e-05, %v946_v21 }
 0x8c8   :  { %v945_v23 = vpop.xlane.xlu0 %944 }
 0x8c9   :  { %3273 = vrsqrt.f32 %v948_v22  ;;  %v947_v24 = vmul.f32 0.03125, %v945_v23 }
 0x8cb   :  { %v949_v25 = vadd.f32 1e-05, %v947_v24  ;;  %v2725_v24 = vld [vmem:[%s4161_s11] ss:$0 sm:$0xff] }
 0x8cd   :  { %3275 = vrsqrt.f32 %v949_v25 }
 0x8d3   :  { %v3274_v26 = vpop.eup %3273 }
 0x8d4   :  { %v952_v28 = vmul.f32 %v3274_v26, %v936_v2  ;;  %v2730_v2 = vld [vmem:[%s4151_s1 + $0x58] sm:$0xff]  ;;  %v2726_v26 = vld [vmem:[%s4162_s12] ss:$0 sm:$0xff] }
 0x8d6   :  { %v960_v31 = vmul.f32 %v2717_v27, %v952_v28 }
 0x8d7   :  { %v3276_v32 = vpop.eup %3275 }
 0x8d8   :  { %v953_v33 = vmul.f32 %v3276_v32, %v937_v1  ;;  %v968_v29 = vadd.f32 %v2718_v30, %v960_v31  ;;  %v2728_v1 = vld [vmem:[%s4151_s1 + $0x48] sm:$0xff] }
 0x8d9   :  { %v3099_v3 = vpack.c.bf16 %v2730_v2, %v2728_v1 }
 0x8da   :  { %v961_v34 = vmul.f32 %v2717_v27, %v953_v33  ;;  %2964 = vmatprep.mubr.msk.f32.mxu0 %vm73_vm0, %v968_v29 }
 0x8db   :  { %3100 = vmatprep.subr.bf16.mxu1 %v3099_v3 }
 0x8dc   :  { %v969_v35 = vadd.f32 %v2718_v30, %v961_v34  ;;  %3102 = vmatpush1.bf16.msra.mxu1 %v3101_v14 }
 0x8dd   :  { %3104 = vmatprep.subr.bf16.mxu1 %v3103_v9 }
 0x8de   :  { %2965 = vmatmul.mubr.msk.f32.vlgmr.msra.gmra.mrb[10].mxu0 %vm73_vm0, %v969_v35 }
 0x8df   :  { %3094 = vmatpush3.bf16.msra.mxu0 %v3091_v18 }
 0x8e0   :  { %3096 = vmatprep.subr.bf16.mxu0 %v3095_v38  ;;  %3106 = vmatpush1.bf16.msra.mxu1 %v3105_v11 }
 0x8e1   :  { %2993 = vmatprep.subr.mxu1 %v3329_v7 }
 0x8e3   :  { %3098 = vmatpush3.bf16.msra.mxu0 %v3095_v38 }
 0x8e4   :  { %2978 = vmatprep.subr.mxu0 %v3329_v7 }
 0x9b1   :  { %v2966_v40 = vpop.f32.mrb[10].mxu0 }
 0x9b2   :  { %v1059_v41 = vadd.f32 %v2966_v40, %v2719_v39  ;;  %v1053_v42 = vpop.f32.mrb[11].mxu0 }
 0x9b3   :  { %v1054_v43 = vadd.f32 %v2719_v39, %v1053_v42 }
 0x9b4   :  { %v1063_v45 = vmax.f32 %v1059_v41, 0.0 }
 0x9b5   :  { %v1062_v44 = vmax.f32 %v1054_v43, 0.0 }
 0x9b7   :  { %2975 = vmatprep.mubr.msk.f32.mxu0 %vm73_vm0, %v1062_v44 }
 0x9b8   :  { %2976 = vmatmul.mubr.msk.f32.vlgmr.msra.gmra.mrb[12].mxu0 %vm73_vm0, %v1063_v45 }
 0x9b9   :  { %2980 = vmatprep.mubr.msk.f32.mxu0 %vm3330_vm1, %v3329_v7 }
 0xa8b   :  { %v2977_v47 = vpop.f32.mrb[12].mxu0 }
 0xa8c   :  { %v1147_v48 = vpop.f32.mrb[13].mxu0  ;;  %v1153_v49 = vadd.f32 %v2977_v47, %v2722_v46 }
 0xa8d   :  { %v1148_v50 = vadd.f32 %v2722_v46, %v1147_v48 }
 0xa8e   :  { %v1157_v53 = vadd.f32 %v1153_v49, %v969_v35 }
 0xa8f   :  { %v1156_v51 = vadd.f32 %v1148_v50, %v968_v29  ;;  %v2735_v29 = vld [vmem:[%s4152_s2 + $0x2] sm:$0x3] }
 0xa90   :  { %v1163_v54 = vsel %vm73_vm0, %v1157_v53, 0.0  ;;  %v1217_v34 = vrot.slane %v2735_v29, %v3465_v17  ;;  %v1221_v35 = vrot.slane %v2735_v29, %v3471_v19 }
 0xa91   :  { %v1160_v52 = vsel %vm73_vm0, %v1156_v51, 0.0 }
 0xa92   :  { %1161 = vadd.xlane.f32.xlu0 %v1160_v52 }
 0xa96   :  { %1164 = vadd.xlane.f32.xlu0 %v1163_v54 }
 0xb1f   :  { %v1162_v55 = vpop.xlane.xlu0 %1161 }
 0xb20   :  { %v1166_v56 = vmul.f32 0.03125, %v1162_v55 }
 0xb22   :  { %v1168_v57 = vsub.f32 %v1156_v51, %v1166_v56 }
 0xb23   :  { %v1165_v58 = vpop.xlane.xlu0 %1164 }
 0xb24   :  { %v1167_v59 = vmul.f32 0.03125, %v1165_v58  ;;  %v1170_v60 = vmul.f32 %v1168_v57, %v1168_v57 }
 0xb26   :  { %v1169_v61 = vsub.f32 %v1157_v53, %v1167_v59  ;;  %v1172_v62 = vsel %vm73_vm0, %v1170_v60, 0.0 }
 0xb27   :  { %1173 = vadd.xlane.f32.xlu0 %v1172_v62 }
 0xb28   :  { %v1171_v63 = vmul.f32 %v1169_v61, %v1169_v61 }
 0xb2a   :  { %v1175_v0 = vsel %vm73_vm0, %v1171_v63, 0.0 }
 0xb2b   :  { %1176 = vadd.xlane.f32.xlu1 %v1175_v0 }
 0xbb4   :  { %v1174_v12 = vpop.xlane.xlu0 %1173 }
 0xbb5   :  { %v1178_v15 = vmul.f32 0.03125, %v1174_v12 }
 0xbb7   :  { %v1180_v18 = vadd.f32 1e-05, %v1178_v15 }
 0xbb8   :  { %v1177_v20 = vpop.xlane.xlu1 %1176 }
 0xbb9   :  { %3277 = vrsqrt.f32 %v1180_v18  ;;  %v1179_v21 = vmul.f32 0.03125, %v1177_v20 }
 0xbbb   :  { %v1181_v22 = vadd.f32 1e-05, %v1179_v21 }
 0xbbd   :  { %3279 = vrsqrt.f32 %v1181_v22 }
 0xbc3   :  { %v3278_v23 = vpop.eup %3277 }
 0xbc4   :  { %v1184_v25 = vmul.f32 %v3278_v23, %v1168_v57 }
 0xbc6   :  { %v1192_v27 = vmul.f32 %v2725_v24, %v1184_v25 }
 0xbc7   :  { %v3280_v28 = vpop.eup %3279 }
 0xbc8   :  { %v3653_v30 = vadd.f32 %v2726_v26, %v1192_v27  ;;  %v1185_v31 = vmul.f32 %v3280_v28, %v1169_v61 }
 0xbca   :  { %2736 = vmatmul.mubr.msk.f32.vlgmr.msra.gmra.mrb[12].mxu1 %vm73_vm0, %v3653_v30  ;;  %v1193_v32 = vmul.f32 %v2725_v24, %v1185_v31 }
 0xbcb   :  { %1300 = vmatprep.mubr.f32.mxu1 %v3329_v7 }
 0xbcc   :  { %v3658_v33 = vadd.f32 %v2726_v26, %v1193_v32 }
 0xbce   :  { %2737 = vmatmul.mubr.msk.f32.gmra.mrb[14].mxu1 %vm73_vm0, %v3658_v33 }
 0xbcf   :  { %2995 = vmatprep.mubr.msk.f32.mxu1 %vm3330_vm1, %v3329_v7 }
 0xc9d   :  { %v1296_v36 = vpop.f32.mrb[12].mxu1 }
 0xc9e   :  { %v1297_v37 = vadd.f32 %v1296_v36, %v1217_v34  ;;  %v1298_v38 = vpop.f32.mrb[13].mxu1 }
 0xc9f   :  { %v3669_v39 = vadd.f32 %v1298_v38, %v1221_v35 }
 0xca0   :  { %1308 = vrot.lane.b32.xlu0 %v1297_v37, %s3331_s0 }
 0xca1   :  { %v1302_v40 = vpop.f32.mrb[14].mxu1 }
 0xca2   :  { %v1303_v41 = vadd.f32 %v1302_v40, %v1217_v34  ;;  %v1304_v42 = vpop.f32.mrb[15].mxu1 }
 0xca3   :  { %v3672_v43 = vadd.f32 %v1304_v42, %v1221_v35 }
 0xca4   :  { %1385 = vrot.lane.b32.xlu1 %v1303_v41, %s3331_s0 }
 0xca5   :  { %2994 = vmatpush3.msra.mxu1 %v3672_v43 }
 0xca6   :  { %3003 = vmatprep.subr.mxu1 %v3329_v7 }
 0xd12   :  { %v1309_v44 = vpop.permute.xlu0 %1308 }
 0xd13   :  { %2979 = vmatpush3.xpose.msk.msra.mxu0 %vm73_vm0, %v1309_v44 }
 0xd14   :  { %2983 = vmatprep.subr.mxu0 %v3329_v7 }
 0xd16   :  { %v1386_v45 = vpop.permute.xlu1 %1385  ;;  %2981 = vmatmul.mubr.msk.f32.vlgmr.msra.gmra.mrb[14].mxu0 %vm73_vm0, %v1297_v37 }
 0xd17   :  { %2984 = vmatpush3.xpose.msk.msra.mxu0 %vm73_vm0, %v1386_v45  ;;  %2985 = vmatprep.mubr.msk.f32.mxu0 %vm3330_vm1, %v3329_v7 }
 0xd18   :  { %2988 = vmatprep.subr.mxu0 %v3329_v7 }
 0xd1a   :  { %2986 = vmatmul.mubr.msk.f32.vlgmr.msra.gmra.mrb[16].mxu0 %vm73_vm0, %v1303_v41 }
 0xd1b   :  { %2989 = vmatpush3.msra.mxu0 %v3669_v39  ;;  %2990 = vmatprep.mubr.msk.f32.mxu0 %vm3330_vm1, %v3329_v7 }
 0xd1c   :  { %2998 = vmatprep.subr.mxu0 %v3329_v7 }
 0xde9   :  { %v1380_v46 = vpop.f32.mrb[14].mxu0 }
 0xdea   :  { %v1461_v47 = vmul.f32 0.17677669, %v1380_v46  ;;  %v2982_v48 = vpop.f32.mrb[15].mxu0 }
 0xdec   :  { %v1463_v49 = vsel %vm313_vm2, %v1461_v47, -inf }
 0xded   :  { %1464 = vmax.xlane.f32.xlu1 %v1463_v49  ;;  %v1457_v50 = vpop.f32.mrb[16].mxu0  ;;  %v2753_v49 = vld [vmem:[%s4153_s3 + $0x58] sm:$0xff] }
 0xdee   :  { %v1462_v51 = vmul.f32 0.17677669, %v1457_v50  ;;  %v2987_v52 = vpop.f32.mrb[17].mxu0 }
 0xdef   :  { %v2755_v52 = vld [vmem:[%s4153_s3 + $0x68] sm:$0xff] }
 0xdf0   :  { %v1466_v53 = vsel %vm313_vm2, %v1462_v51, -inf }
 0xdf1   :  { %1467 = vmax.xlane.f32.xlu0 %v1466_v53 }
 0xdfe   :  { %1711 = vrot.lane.b32.xlu1 %v1303_v41, %s3332_s25 }
 0xe7a   :  { %v1465_v54 = vpop.xlane.xlu1 %1464 }
 0xe7b   :  { %v1469_v55 = vsub.f32 %v1461_v47, %v1465_v54  ;;  %v2752_v47 = vld [vmem:[%s4153_s3 + $0x50] sm:$0xff] }
 0xe7c   :  { %v3111_v50 = vpack.c.bf16 %v2753_v49, %v2752_v47  ;;  %v2756_v54 = vld [vmem:[%s4153_s3 + $0x70] sm:$0xff]  ;;  %v2777_v49 = vld [vmem:[%s4159_s9 + $0x38] sm:$0xff] }
 0xe7d   :  { %v1471_v56 = vmul.f32 1.442695, %v1469_v55  ;;  %v2757_v55 = vld [vmem:[%s4153_s3 + $0x78] sm:$0xff] }
 0xe7e   :  { %v1468_v57 = vpop.xlane.xlu0 %1467  ;;  %v1712_v0 = vpop.permute.xlu1 %1711 }
 0xe7f   :  { %3281 = vpow2.f32 %v1471_v56  ;;  %v1470_v58 = vsub.f32 %v1462_v51, %v1468_v57  ;;  %v2754_v51 = vld [vmem:[%s4153_s3 + $0x60] sm:$0xff]  ;;  %v3119_v56 = vpack.c.bf16 %v2757_v55, %v2756_v54 }
 0xe80   :  { %v3115_v53 = vpack.c.bf16 %v2755_v52, %v2754_v51  ;;  %v2771_v51 = vld [vmem:[%s4158_s8 + $0x1] ss:$0 sm:$0xff] }
 0xe81   :  { %v1473_v59 = vmul.f32 1.442695, %v1470_v58 }
 0xe83   :  { %3283 = vpow2.f32 %v1473_v59 }
 0xe89   :  { %v3282_v60 = vpop.eup %3281 }
 0xe8a   :  { %v1475_v61 = vsel %vm313_vm2, %v3282_v60, 0.0 }
 0xe8b   :  { %1476 = vadd.xlane.f32.xlu0 %v1475_v61 }
 0xe8d   :  { %v3284_v62 = vpop.eup %3283 }
 0xe8e   :  { %v1478_v63 = vsel %vm313_vm2, %v3284_v62, 0.0 }
 0xe8f   :  { %1479 = vadd.xlane.f32.xlu1 %v1478_v63 }
 0xea0   :  { %1631 = vrot.lane.b32.xlu1 %v1297_v37, %s3333_s26 }
 0xea1   :  { %1633 = vrot.lane.b32.xlu0 %v1297_v37, %s3332_s25 }
 0xea5   :  { %1709 = vrot.lane.b32.xlu0 %v1303_v41, %s3333_s26 }
 0xf18   :  { %v1477_v1 = vpop.xlane.xlu0 %1476 }
 0xf19   :  { %3285 = vrcp.f32 %v1477_v1  ;;  %v2759_v1 = vld [vmem:[%s4154_s4 + $0x1] ss:$0 sm:$0xff] }
 0xf1c   :  { %v1480_v2 = vpop.xlane.xlu1 %1479  ;;  %v1634_v5 = vpop.permute.xlu0 %1633 }
 0xf1d   :  { %3287 = vrcp.f32 %v1480_v2 }
 0xf20   :  { %v1632_v6 = vpop.permute.xlu1 %1631  ;;  %v1710_v8 = vpop.permute.xlu0 %1709 }
 0xf23   :  { %v3286_v3 = vpop.eup %3285 }
 0xf24   :  { %v1482_v4 = vmul.f32 %v3286_v3, %v3282_v60 }
 0xf26   :  { %2991 = vmatmul.mubr.msk.f32.vlgmr.msra.gmra.mrb[18].mxu0 %vm313_vm2, %v1482_v4 }
 0xf27   :  { %v3288_v14 = vpop.eup %3287  ;;  %2999 = vmatpush3.xpose.msk.msra.mxu0 %vm73_vm0, %v1634_v5  ;;  %3000 = vmatprep.mubr.msk.f32.mxu0 %vm3330_vm1, %v3329_v7 }
 0xf28   :  { %v1484_v13 = vmul.f32 %v3288_v14, %v3284_v62  ;;  %3008 = vmatprep.subr.mxu0 %v3329_v7 }
 0xf2a   :  { %2996 = vmatmul.mubr.msk.f32.vlgmr.msra.gmra.mrb[16].mxu1 %vm313_vm2, %v1484_v13  ;;  %3001 = vmatmul.mubr.msk.f32.vlgmr.msra.gmra.mrb[20].mxu0 %vm73_vm0, %v1632_v6 }
 0xf2b   :  { %3004 = vmatpush3.xpose.msk.msra.mxu1 %vm73_vm0, %v1712_v0  ;;  %3005 = vmatprep.mubr.msk.f32.mxu1 %vm3330_vm1, %v3329_v7 }
 0xf2c   :  { %3013 = vmatprep.subr.mxu1 %v3329_v7  ;;  %3010 = vmatprep.mubr.msk.f32.mxu0 %vm3330_vm1, %v3329_v7 }
 0xf2e   :  { %3006 = vmatmul.mubr.msk.f32.vlgmr.msra.gmra.mrb[18].mxu1 %vm73_vm0, %v1710_v8 }
 0xf2f   :  { %3015 = vmatprep.mubr.msk.f32.mxu1 %vm3330_vm1, %v3329_v7 }
 0xff9   :  { %v3713_v9 = vpop.f32.mrb[18].mxu0 }
 0xffa   :  { %v2992_v10 = vpop.f32.mrb[19].mxu0 }
 0xffd   :  { %v3715_v11 = vpop.f32.mrb[16].mxu1  ;;  %v1705_v12 = vpop.f32.mrb[20].mxu0 }
 0xffe   :  { %v1787_v15 = vmul.f32 0.17677669, %v1705_v12  ;;  %v2997_v18 = vpop.f32.mrb[17].mxu1  ;;  %v3002_v20 = vpop.f32.mrb[21].mxu0 }
0x1000   :  { %v1789_v21 = vsel %vm313_vm2, %v1787_v15, -inf }
0x1001   :  { %v1783_v22 = vpop.f32.mrb[18].mxu1  ;;  %1790 = vmax.xlane.f32.xlu1 %v1789_v21 }
0x1002   :  { %v1788_v23 = vmul.f32 0.17677669, %v1783_v22  ;;  %v3007_v24 = vpop.f32.mrb[19].mxu1 }
0x1004   :  { %v1792_v25 = vsel %vm313_vm2, %v1788_v23, -inf }
0x1005   :  { %1793 = vmax.xlane.f32.xlu0 %v1792_v25  ;;  %v2768_v25 = vld [vmem:[%s4157_s7 + $0x30] sm:$0xff] }
0x108e   :  { %v1791_v26 = vpop.xlane.xlu1 %1790 }
0x108f   :  { %v1795_v7 = vsub.f32 %v1787_v15, %v1791_v26  ;;  %v2769_v26 = vld [vmem:[%s4157_s7 + $0x38] sm:$0xff] }
0x1091   :  { %v1797_v27 = vmul.f32 1.442695, %v1795_v7  ;;  %v3127_v7 = vpack.c.bf16 %v2769_v26, %v2768_v25  ;;  %v2420_v25 = vld [vmem:[%s4163_s13 + $0x48] sm:$0xff] }
0x1092   :  { %v1794_v28 = vpop.xlane.xlu0 %1793  ;;  %v2424_v26 = vld [vmem:[%s4163_s13 + $0x68] sm:$0xff] }
0x1093   :  { %3289 = vpow2.f32 %v1797_v27  ;;  %v1796_v31 = vsub.f32 %v1788_v23, %v1794_v28  ;;  %v2767_v23 = vld [vmem:[%s4157_s7 + $0x28] sm:$0xff]  ;;  %v2774_v27 = vld [vmem:[%s4159_s9 + $0x20] sm:$0xff] }
0x1094   :  { %v2775_v28 = vld [vmem:[%s4159_s9 + $0x28] sm:$0xff] }
0x1095   :  { %v1799_v32 = vmul.f32 1.442695, %v1796_v31  ;;  %v3131_v31 = vpack.c.bf16 %v2775_v28, %v2774_v27 }
0x1097   :  { %3291 = vpow2.f32 %v1799_v32 }
0x109d   :  { %v3290_v29 = vpop.eup %3289 }
0x109e   :  { %v1801_v34 = vsel %vm313_vm2, %v3290_v29, 0.0 }
0x109f   :  { %1802 = vadd.xlane.f32.xlu0 %v1801_v34 }
0x10a1   :  { %v3292_v35 = vpop.eup %3291 }
0x10a2   :  { %v1804_v36 = vsel %vm313_vm2, %v3292_v35, 0.0 }
0x10a3   :  { %1805 = vadd.xlane.f32.xlu1 %v1804_v36 }
0x10b4   :  { %1889 = vrot.lane.b32.xlu1 %v3672_v43, %s3333_s26  ;;  %v2751_v43 = vld [vmem:[%s4153_s3 + $0x48] sm:$0xff] }
0x10b5   :  { %1812 = vrot.lane.b32.xlu0 %v3669_v39, %s3333_s26  ;;  %v2750_v39 = vld [vmem:[%s4153_s3 + $0x40] sm:$0xff] }
0x10b6   :  { %v3107_v48 = vpack.c.bf16 %v2751_v43, %v2750_v39 }
0x112c   :  { %v1803_v37 = vpop.xlane.xlu0 %1802 }
0x112d   :  { %3293 = vrcp.f32 %v1803_v37 }
0x1130   :  { %v1813_v38 = vpop.permute.xlu0 %1812  ;;  %v1806_v40 = vpop.xlane.xlu1 %1805 }
0x1131   :  { %3295 = vrcp.f32 %v1806_v40  ;;  %3009 = vmatpush3.msra.mxu0 %v1813_v38  ;;  %v2764_v40 = vld [vmem:[%s4155_s5 + $0x1] ss:$0 sm:$0xff] }
0x1134   :  { %v1890_v41 = vpop.permute.xlu1 %1889 }
0x1135   :  { %3014 = vmatpush3.msra.mxu1 %v1890_v41 }
0x1136   :  { %3108 = vmatprep.subr.bf16.mxu1 %v3107_v48 }
0x1137   :  { %v3294_v42 = vpop.eup %3293 }
0x1138   :  { %v1808_v44 = vmul.f32 %v3294_v42, %v3290_v29 }
0x113a   :  { %3011 = vmatmul.mubr.msk.f32.vlgmr.msra.gmra.mrb[22].mxu0 %vm313_vm2, %v1808_v44 }
0x113b   :  { %v3296_v45 = vpop.eup %3295 }
0x113c   :  { %v1810_v46 = vmul.f32 %v3296_v45, %v3292_v35  ;;  %v2765_v45 = vld [vmem:[%s4156_s6 + $0x1] ss:$0 sm:$0xff] }
0x113e   :  { %3016 = vmatmul.mubr.msk.f32.vlgmr.msra.gmra.mrb[20].mxu1 %vm313_vm2, %v1810_v46 }
0x113f   :  { %3110 = vmatpush3.bf16.msra.mxu1 %v3107_v48  ;;  %v2776_v48 = vld [vmem:[%s4159_s9 + $0x30] sm:$0xff] }
0x1140   :  { %3112 = vmatprep.subr.bf16.mxu1 %v3111_v50 }
0x1143   :  { %3114 = vmatpush3.bf16.msra.mxu1 %v3111_v50  ;;  %v3135_v50 = vpack.c.bf16 %v2777_v49, %v2776_v48  ;;  %v2438_v48 = vld [vmem:[%s4163_s13 + $0xd8] sm:$0xff] }
0x1144   :  { %3116 = vmatprep.subr.bf16.mxu1 %v3115_v53  ;;  %v2442_v49 = vld [vmem:[%s4163_s13 + $0xf8] sm:$0xff] }
0x1147   :  { %3118 = vmatpush3.bf16.msra.mxu1 %v3115_v53 }
0x1148   :  { %3120 = vmatprep.subr.bf16.mxu1 %v3119_v56 }
0x114b   :  { %3122 = vmatpush3.bf16.msra.mxu1 %v3119_v56 }
0x120d   :  { %v1884_v57 = vpop.f32.mrb[22].mxu0 }
0x120e   :  { %1967 = vrot.lane.b32.xlu1 %v1884_v57, %s3332_s25  ;;  %v3012_v58 = vpop.f32.mrb[23].mxu0 }
0x120f   :  { %v2779_v58 = vld [vmem:[%s4160_s10 + $0x1] ss:$0 sm:$0xff] }
0x1211   :  { %v1961_v59 = vpop.f32.mrb[20].mxu1 }
0x1212   :  { %1969 = vrot.lane.b32.xlu0 %v1961_v59, %s3332_s25  ;;  %v3017_v60 = vpop.f32.mrb[21].mxu1 }
0x1280   :  { %v1968_v61 = vpop.permute.xlu1 %1967 }
0x1281   :  { %v1973_v62 = vsel %vm73_vm0, %v3713_v9, %v1968_v61 }
0x1282   :  { %3034 = vmatprep.mubr.msk.f32.mxu1 %vm841_vm3, %v1973_v62 }
0x1284   :  { %v1970_v63 = vpop.permute.xlu0 %1969 }
0x1285   :  { %v1974_v0 = vsel %vm73_vm0, %v3715_v11, %v1970_v63 }
0x1286   :  { %3035 = vmatmul.mubr.msk.f32.vlgmr.msra.gmra.mrb[22].mxu1 %vm841_vm3, %v1974_v0 }
0x1359   :  { %v3036_v2 = vpop.f32.mrb[22].mxu1 }
0x135a   :  { %v2070_v3 = vadd.f32 %v3036_v2, %v2759_v1  ;;  %v2064_v4 = vpop.f32.mrb[23].mxu1 }
0x135b   :  { %v2065_v5 = vadd.f32 %v2759_v1, %v2064_v4 }
0x135c   :  { %v2074_v14 = vadd.f32 %v2070_v3, %v3658_v33 }
0x135d   :  { %v2073_v13 = vadd.f32 %v2065_v5, %v3653_v30  ;;  %v2766_v30 = vld [vmem:[%s4157_s7 + $0x20] sm:$0xff] }
0x135e   :  { %v2082_v6 = vsel %vm73_vm0, %v2074_v14, 0.0  ;;  %v3123_v24 = vpack.c.bf16 %v2767_v23, %v2766_v30 }
0x135f   :  { %2083 = vadd.xlane.f32.xlu0 %v2082_v6  ;;  %v2079_v8 = vsel %vm73_vm0, %v2073_v13, 0.0 }
0x1360   :  { %2080 = vadd.xlane.f32.xlu1 %v2079_v8  ;;  %3124 = vmatprep.subr.bf16.mxu1 %v3123_v24 }
0x1361   :  { %3126 = vmatpush3.bf16.msra.mxu1 %v3123_v24  ;;  %v2417_v24 = vld [vmem:[%s4163_s13 + $0x30] sm:$0xff] }
0x1362   :  { %3128 = vmatprep.subr.bf16.mxu1 %v3127_v7  ;;  %v3145_v27 = vpack.c.bf16 %v2420_v25, %v2417_v24  ;;  %v2453_v25 = vld [vmem:[%s4163_s13 + $0x150] sm:$0xff] }
0x1365   :  { %3130 = vmatpush3.bf16.msra.mxu1 %v3127_v7  ;;  %v2427_v7 = vld [vmem:[%s4163_s13 + $0x80] sm:$0xff] }
0x1366   :  { %3132 = vmatprep.subr.bf16.mxu1 %v3131_v31  ;;  %v3147_v28 = vpack.c.bf16 %v2427_v7, %v2424_v26  ;;  %v2456_v26 = vld [vmem:[%s4163_s13 + $0x168] sm:$0xff] }
0x13ec   :  { %v2084_v9 = vpop.xlane.xlu0 %2083 }
0x13ed   :  { %v2086_v10 = vmul.f32 0.03125, %v2084_v9  ;;  %v2081_v11 = vpop.xlane.xlu1 %2080 }
0x13ee   :  { %v2085_v12 = vmul.f32 0.03125, %v2081_v11 }
0x13ef   :  { %v2088_v15 = vsub.f32 %v2074_v14, %v2086_v10 }
0x13f0   :  { %v2087_v18 = vsub.f32 %v2073_v13, %v2085_v12  ;;  %v2412_v12 = vld [vmem:[%s4163_s13 + $0x8] sm:$0xff] }
0x13f1   :  { %v2090_v20 = vmul.f32 %v2088_v15, %v2088_v15 }
0x13f2   :  { %v2089_v21 = vmul.f32 %v2087_v18, %v2087_v18 }
0x13f3   :  { %v2094_v22 = vsel %vm73_vm0, %v2090_v20, 0.0 }
0x13f4   :  { %2095 = vadd.xlane.f32.xlu1 %v2094_v22  ;;  %v2091_v33 = vsel %vm73_vm0, %v2089_v21, 0.0  ;;  %v2414_v21 = vld [vmem:[%s4163_s13 + $0x18] sm:$0xff] }
0x13f5   :  { %2092 = vadd.xlane.f32.xlu0 %v2091_v33  ;;  %v2418_v22 = vld [vmem:[%s4163_s13 + $0x38] sm:$0xff]  ;;  %v2421_v33 = vld [vmem:[%s4163_s13 + $0x50] sm:$0xff] }
0x13f6   :  { %v3143_v23 = vpack.c.bf16 %v2421_v33, %v2418_v22  ;;  %v2434_v22 = vld [vmem:[%s4163_s13 + $0xb8] sm:$0xff]  ;;  %v2457_v33 = vld [vmem:[%s4163_s13 + $0x170] sm:$0xff] }
0x1481   :  { %v2096_v32 = vpop.xlane.xlu1 %2095 }
0x1482   :  { %v2098_v29 = vmul.f32 0.03125, %v2096_v32  ;;  %v2093_v34 = vpop.xlane.xlu0 %2092  ;;  %v2426_v32 = vld [vmem:[%s4163_s13 + $0x78] sm:$0xff] }
0x1483   :  { %v2097_v35 = vmul.f32 0.03125, %v2093_v34  ;;  %v2433_v34 = vld [vmem:[%s4163_s13 + $0xb0] sm:$0xff] }
0x1484   :  { %v2100_v36 = vadd.f32 1e-05, %v2098_v29  ;;  %v2430_v29 = vld [vmem:[%s4163_s13 + $0x98] sm:$0xff] }
0x1485   :  { %v2099_v37 = vadd.f32 1e-05, %v2097_v35 }
0x1486   :  { %3297 = vrsqrt.f32 %v2100_v36  ;;  %v3151_v36 = vpack.c.bf16 %v2433_v34, %v2430_v29  ;;  %v2440_v29 = vld [vmem:[%s4163_s13 + $0xe8] sm:$0xff]  ;;  %v2463_v34 = vld [vmem:[%s4163_s13 + $0x1a0] sm:$0xff] }
0x1487   :  { %3299 = vrsqrt.f32 %v2099_v37  ;;  %v2429_v37 = vld [vmem:[%s4163_s13 + $0x90] sm:$0xff] }
0x1490   :  { %v3298_v38 = vpop.eup %3297 }
0x1491   :  { %v3300_v41 = vpop.eup %3299  ;;  %v2104_v42 = vmul.f32 %v3298_v38, %v2088_v15  ;;  %v2415_v15 = vld [vmem:[%s4163_s13 + $0x20] sm:$0xff]  ;;  %v2432_v38 = vld [vmem:[%s4163_s13 + $0xa8] sm:$0xff] }
0x1492   :  { %v2103_v44 = vmul.f32 %v3300_v41, %v2087_v18  ;;  %v2411_v18 = vld [vmem:[%s4163_s13] sm:$0xff]  ;;  %v3139_v20 = vpack.c.bf16 %v2415_v15, %v2412_v12 }
0x1493   :  { %v2112_v46 = vmul.f32 %v2764_v40, %v2104_v42  ;;  %v3141_v30 = vpack.c.bf16 %v2414_v21, %v2411_v18  ;;  %v2439_v41 = vld [vmem:[%s4163_s13 + $0xe0] sm:$0xff]  ;;  %v2461_v42 = vld [vmem:[%s4163_s13 + $0x190] sm:$0xff]  ;;  %v2454_v18 = vld [vmem:[%s4163_s13 + $0x158] sm:$0xff] }
0x1494   :  { %v2111_v39 = vmul.f32 %v2764_v40, %v2103_v44  ;;  %3140 = vmatprep.subr.bf16.mxu0 %v3139_v20  ;;  %v2436_v40 = vld [vmem:[%s4163_s13 + $0xc8] sm:$0xff]  ;;  %v2431_v21 = vld [vmem:[%s4163_s13 + $0xa0] sm:$0xff] }
0x1495   :  { %v2120_v47 = vadd.f32 %v2765_v45, %v2112_v46  ;;  %3142 = vmatpush1.bf16.msra.mxu0 %v3141_v30  ;;  %v2464_v44 = vld [vmem:[%s4163_s13 + $0x1a8] sm:$0xff]  ;;  %v2435_v46 = vld [vmem:[%s4163_s13 + $0xc0] sm:$0xff]  ;;  %v2485_v30 = vld [vmem:[%s4163_s13 + $0x250] sm:$0xff]  ;;  %v3217_v7 = vpack.c.bf16 %v2434_v22, %v2431_v21 }
0x1496   :  { %v2119_v43 = vadd.f32 %v2765_v45, %v2111_v39  ;;  %3144 = vmatprep.subr.bf16.mxu0 %v3143_v23  ;;  %v3153_v45 = vpack.c.bf16 %v2432_v38, %v2429_v37  ;;  %v3203_v39 = vpack.c.bf16 %v2464_v44, %v2461_v42  ;;  %v2488_v23 = vld [vmem:[%s4163_s13 + $0x268] sm:$0xff]  ;;  %v3169_v37 = vpack.c.bf16 %v2456_v26, %v2453_v25  ;;  %v2459_v38 = vld [vmem:[%s4163_s13 + $0x180] sm:$0xff]  ;;  %v2462_v42 = vld [vmem:[%s4163_s13 + $0x198] sm:$0xff] }
0x1497   :  { %v2785_v26 = vld [vmem:[%s4162_s12 + $0x1] ss:$0 sm:$0xff] }
0x1498   :  { %3045 = vmatprep.mubr.msk.f32.mxu1 %vm73_vm0, %v2119_v43 }
0x1499   :  { %3046 = vmatmul.mubr.msk.f32.vlgmr.msra.gmra.mrb[24].mxu1 %vm73_vm0, %v2120_v47  ;;  %3146 = vmatpush1.bf16.msra.mxu0 %v3145_v27  ;;  %v3167_v27 = vpack.c.bf16 %v2457_v33, %v2454_v18 }
0x149a   :  { %3134 = vmatpush3.bf16.msra.mxu1 %v3131_v31  ;;  %v2423_v31 = vld [vmem:[%s4163_s13 + $0x60] sm:$0xff]  ;;  %3148 = vmatprep.subr.bf16.mxu0 %v3147_v28  ;;  %v2460_v28 = vld [vmem:[%s4163_s13 + $0x188] sm:$0xff] }
0x149b   :  { %3136 = vmatprep.subr.bf16.mxu1 %v3135_v50  ;;  %v3149_v35 = vpack.c.bf16 %v2426_v32, %v2423_v31  ;;  %v3219_v31 = vpack.c.bf16 %v2488_v23, %v2485_v30  ;;  %v2437_v32 = vld [vmem:[%s4163_s13 + $0xd0] sm:$0xff] }
0x149d   :  { %3150 = vmatpush1.bf16.msra.mxu0 %v3149_v35  ;;  %v2491_v35 = vld [vmem:[%s4163_s13 + $0x280] sm:$0xff] }
0x149e   :  { %3138 = vmatpush3.bf16.msra.mxu1 %v3135_v50  ;;  %3152 = vmatprep.subr.bf16.mxu0 %v3151_v36  ;;  %v2416_v50 = vld [vmem:[%s4163_s13 + $0x28] sm:$0xff]  ;;  %v2494_v36 = vld [vmem:[%s4163_s13 + $0x298] sm:$0xff] }
0x149f   :  { %3204 = vmatprep.subr.bf16.mxu1 %v3203_v39  ;;  %v3223_v44 = vpack.c.bf16 %v2494_v36, %v2491_v35  ;;  %v2466_v39 = vld [vmem:[%s4163_s13 + $0x1b8] sm:$0xff] }
0x14a0   :  { %v2498_v35 = vld [vmem:[%s4163_s13 + $0x2b8] sm:$0xff] }
0x14a1   :  { %3154 = vmatpush1.bf16.msra.mxu0 %v3153_v45  ;;  %v2443_v45 = vld [vmem:[%s4163_s13 + $0x100] sm:$0xff] }
0x156c   :  { %v3047_v52 = vpop.f32.mrb[24].mxu1 }
0x156d   :  { %v2212_v53 = vadd.f32 %v3047_v52, %v2771_v51  ;;  %v2206_v54 = vpop.f32.mrb[25].mxu1 }
0x156e   :  { %v2207_v55 = vadd.f32 %v2771_v51, %v2206_v54  ;;  %v2445_v51 = vld [vmem:[%s4163_s13 + $0x110] sm:$0xff]  ;;  %v2470_v54 = vld [vmem:[%s4163_s13 + $0x1d8] sm:$0xff] }
0x156f   :  { %v2216_v57 = vmax.f32 %v2212_v53, 0.0  ;;  %v2467_v53 = vld [vmem:[%s4163_s13 + $0x1c0] sm:$0xff] }
0x1570   :  { %v2215_v56 = vmax.f32 %v2207_v55, 0.0  ;;  %v3207_v55 = vpack.c.bf16 %v2470_v54, %v2467_v53  ;;  %v2475_v53 = vld [vmem:[%s4163_s13 + $0x200] sm:$0xff] }
0x1572   :  { %3056 = vmatprep.mubr.msk.f32.mxu1 %vm73_vm0, %v2215_v56  ;;  %v2419_v56 = vld [vmem:[%s4163_s13 + $0x40] sm:$0xff] }
0x1573   :  { %3057 = vmatmul.mubr.msk.f32.vlgmr.msra.gmra.mrb[26].mxu1 %vm73_vm0, %v2216_v57  ;;  %v2422_v57 = vld [vmem:[%s4163_s13 + $0x58] sm:$0xff] }
0x1646   :  { %v3058_v59 = vpop.f32.mrb[26].mxu1 }
0x1647   :  { %v2308_v60 = vadd.f32 %v3058_v59, %v2779_v58  ;;  %v2302_v61 = vpop.f32.mrb[27].mxu1  ;;  %v2441_v59 = vld [vmem:[%s4163_s13 + $0xf0] sm:$0xff] }
0x1648   :  { %v2303_v62 = vadd.f32 %v2779_v58, %v2302_v61  ;;  %v3157_v58 = vpack.c.bf16 %v2438_v48, %v2435_v46  ;;  %v2473_v61 = vld [vmem:[%s4163_s13 + $0x1f0] sm:$0xff]  ;;  %v2446_v46 = vld [vmem:[%s4163_s13 + $0x118] sm:$0xff] }
0x1649   :  { %v2312_v63 = vadd.f32 %v2308_v60, %v2120_v47  ;;  %v3155_v47 = vpack.c.bf16 %v2439_v41, %v2436_v40  ;;  %v3209_v60 = vpack.c.bf16 %v2422_v57, %v2419_v56  ;;  %v3221_v40 = vpack.c.bf16 %v2440_v29, %v2437_v32  ;;  %v2471_v56 = vld [vmem:[%s4163_s13 + $0x1e0] sm:$0xff]  ;;  %v2474_v57 = vld [vmem:[%s4163_s13 + $0x1f8] sm:$0xff]  ;;  %v2497_v32 = vld [vmem:[%s4163_s13 + $0x2b0] sm:$0xff] }
0x164a   :  { %v2311_v0 = vadd.f32 %v2303_v62, %v2119_v43  ;;  %v2413_v43 = vld [vmem:[%s4163_s13 + $0x10] sm:$0xff]  ;;  %v3159_v62 = vpack.c.bf16 %v2445_v51, %v2442_v49  ;;  %v3171_v41 = vpack.c.bf16 %v2463_v34, %v2460_v28  ;;  %v3225_v48 = vpack.c.bf16 %v2446_v46, %v2443_v45  ;;  %v2468_v51 = vld [vmem:[%s4163_s13 + $0x1c8] sm:$0xff] }
0x164b   :  { %v2320_v1 = vsel %vm73_vm0, %v2312_v63, 0.0  ;;  %v3205_v52 = vpack.c.bf16 %v2416_v50, %v2413_v43  ;;  %3156 = vmatprep.subr.bf16.mxu0 %v3155_v47  ;;  %v2469_v43 = vld [vmem:[%s4163_s13 + $0x1d0] sm:$0xff]  ;;  %v3173_v47 = vpack.c.bf16 %v2462_v42, %v2459_v38  ;;  %v2496_v28 = vld [vmem:[%s4163_s13 + $0x2a8] sm:$0xff]  ;;  %v2502_v42 = vld [vmem:[%s4163_s13 + $0x2d8] sm:$0xff] }
0x164c   :  { %2321 = vadd.xlane.f32.xlu1 %v2320_v1  ;;  %v2317_v2 = vsel %vm73_vm0, %v2311_v0, 0.0  ;;  %v2476_v1 = vld [vmem:[%s4163_s13 + $0x208] sm:$0xff]  ;;  %3158 = vmatpush1.bf16.msra.mxu0 %v3157_v58  ;;  %v3175_v49 = vpack.c.bf16 %v2469_v43, %v2466_v39  ;;  %v2465_v50 = vld [vmem:[%s4163_s13 + $0x1b0] sm:$0xff]  ;;  %v2478_v58 = vld [vmem:[%s4163_s13 + $0x218] sm:$0xff] }
0x164d   :  { %2318 = vadd.xlane.f32.xlu0 %v2317_v2  ;;  %3206 = vmatpush3.bf16.msra.mxu1 %v3205_v52  ;;  %v2451_v2 = vld [vmem:[%s4163_s13 + $0x140] sm:$0xff]  ;;  %v2472_v52 = vld [vmem:[%s4163_s13 + $0x1e8] sm:$0xff]  ;;  %v3177_v54 = vpack.c.bf16 %v2468_v51, %v2465_v50  ;;  %v2505_v46 = vld [vmem:[%s4163_s13 + $0x2f0] sm:$0xff] }
0x164e   :  { %3208 = vmatprep.subr.bf16.mxu1 %v3207_v55  ;;  %3160 = vmatprep.subr.bf16.mxu0 %v3159_v62  ;;  %v3179_v55 = vpack.c.bf16 %v2475_v53, %v2472_v52  ;;  %v2477_v62 = vld [vmem:[%s4163_s13 + $0x210] sm:$0xff]  ;;  %v2503_v39 = vld [vmem:[%s4163_s13 + $0x2e0] sm:$0xff]  ;;  %v2506_v43 = vld [vmem:[%s4163_s13 + $0x2f8] sm:$0xff] }
0x1651   :  { %3210 = vmatpush3.bf16.msra.mxu1 %v3209_v60  ;;  %v3181_v60 = vpack.c.bf16 %v2474_v57, %v2471_v56 }
0x16d9   :  { %v2322_v3 = vpop.xlane.xlu1 %2321 }
0x16da   :  { %v2324_v4 = vmul.f32 0.03125, %v2322_v3  ;;  %v2319_v5 = vpop.xlane.xlu0 %2318  ;;  %v3211_v3 = vpack.c.bf16 %v2476_v1, %v2473_v61  ;;  %v2487_v1 = vld [vmem:[%s4163_s13 + $0x260] sm:$0xff] }
0x16db   :  { %v2323_v14 = vmul.f32 0.03125, %v2319_v5  ;;  %v2428_v5 = vld [vmem:[%s4163_s13 + $0x88] sm:$0xff] }
0x16dc   :  { %v3810_v13 = vsub.f32 %v2312_v63, %v2324_v4  ;;  %v2444_v63 = vld [vmem:[%s4163_s13 + $0x108] sm:$0xff]  ;;  %v2425_v4 = vld [vmem:[%s4163_s13 + $0x70] sm:$0xff]  ;;  %3212 = vmatprep.subr.bf16.mxu1 %v3211_v3 }
0x16dd   :  { %v3812_v6 = vsub.f32 %v2311_v0, %v2323_v14  ;;  %v2448_v0 = vld [vmem:[%s4163_s13 + $0x128] sm:$0xff]  ;;  %v2479_v14 = vld [vmem:[%s4163_s13 + $0x220] sm:$0xff]  ;;  %v3213_v12 = vpack.c.bf16 %v2428_v5, %v2425_v4  ;;  %v2486_v5 = vld [vmem:[%s4163_s13 + $0x258] sm:$0xff] }
0x16de   :  { %v2328_v8 = vmul.f32 %v3810_v13, %v3810_v13  ;;  %v3163_v15 = vpack.c.bf16 %v2451_v2, %v2448_v0  ;;  %v2484_v0 = vld [vmem:[%s4163_s13 + $0x248] sm:$0xff]  ;;  %v2483_v4 = vld [vmem:[%s4163_s13 + $0x240] sm:$0xff] }
0x16df   :  { %v2327_v9 = vmul.f32 %v3812_v6, %v3812_v6  ;;  %3214 = vmatpush3.bf16.msra.mxu1 %v3213_v12  ;;  %v3187_v3 = vpack.c.bf16 %v2487_v1, %v2484_v0  ;;  %v2492_v12 = vld [vmem:[%s4163_s13 + $0x288] sm:$0xff] }
0x16e0   :  { %v2332_v10 = vsel %vm73_vm0, %v2328_v8, 0.0  ;;  %v2482_v8 = vld [vmem:[%s4163_s13 + $0x238] sm:$0xff] }
0x16e1   :  { %2333 = vadd.xlane.f32.xlu1 %v2332_v10  ;;  %v2329_v11 = vsel %vm73_vm0, %v2327_v9, 0.0  ;;  %v3161_v9 = vpack.c.bf16 %v2444_v63, %v2441_v59  ;;  %v2447_v10 = vld [vmem:[%s4163_s13 + $0x120] sm:$0xff]  ;;  %v3215_v20 = vpack.c.bf16 %v2482_v8, %v2479_v14  ;;  %v2481_v59 = vld [vmem:[%s4163_s13 + $0x230] sm:$0xff]  ;;  %v2480_v63 = vld [vmem:[%s4163_s13 + $0x228] sm:$0xff] }
0x16e2   :  { %2330 = vadd.xlane.f32.xlu0 %v2329_v11  ;;  %v2450_v11 = vld [vmem:[%s4163_s13 + $0x138] sm:$0xff]  ;;  %v3183_v61 = vpack.c.bf16 %v2481_v59, %v2478_v58  ;;  %v3185_v2 = vpack.c.bf16 %v2480_v63, %v2477_v62  ;;  %v2493_v8 = vld [vmem:[%s4163_s13 + $0x290] sm:$0xff] }
0x16e3   :  { %3162 = vmatpush1.bf16.msra.mxu0 %v3161_v9  ;;  %v3165_v24 = vpack.c.bf16 %v2450_v11, %v2447_v10  ;;  %3216 = vmatprep.subr.bf16.mxu1 %v3215_v20  ;;  %v2490_v14 = vld [vmem:[%s4163_s13 + $0x278] sm:$0xff]  ;;  %v3189_v9 = vpack.c.bf16 %v2486_v5, %v2483_v4  ;;  %v2489_v11 = vld [vmem:[%s4163_s13 + $0x270] sm:$0xff]  ;;  %v2455_v4 = vld [vmem:[%s4163_s13 + $0x160] sm:$0xff] }
0x16e4   :  { %3164 = vmatprep.subr.bf16.mxu0 %v3163_v15  ;;  %3218 = vmatpush3.bf16.msra.mxu1 %v3217_v7  ;;  %v3191_v10 = vpack.c.bf16 %v2493_v8, %v2490_v14  ;;  %v3193_v15 = vpack.c.bf16 %v2492_v12, %v2489_v11  ;;  %v2501_v62 = vld [vmem:[%s4163_s13 + $0x2d0] sm:$0xff]  ;;  %v2458_v5 = vld [vmem:[%s4163_s13 + $0x178] sm:$0xff] }
0x16e5   :  { %3220 = vmatprep.subr.bf16.mxu1 %v3219_v31  ;;  %v2499_v31 = vld [vmem:[%s4163_s13 + $0x2c0] sm:$0xff] }
0x16e6   :  { %v3195_v34 = vpack.c.bf16 %v2499_v31, %v2496_v28 }
0x16e7   :  { %3166 = vmatpush1.bf16.msra.mxu0 %v3165_v24  ;;  %v2784_v24 = vld [vmem:[%s4161_s11 + $0x1] ss:$0 sm:$0xff] }
0x16e8   :  { %3168 = vmatprep.subr.bf16.mxu0 %v3167_v27  ;;  %3222 = vmatpush3.bf16.msra.mxu1 %v3221_v40  ;;  %v2449_v40 = vld [vmem:[%s4163_s13 + $0x130] sm:$0xff] }
0x16e9   :  { %3224 = vmatprep.subr.bf16.mxu1 %v3223_v44 }
0x16eb   :  { %3170 = vmatpush1.bf16.msra.mxu0 %v3169_v37 }
0x16ec   :  { %3172 = vmatprep.subr.bf16.mxu0 %v3171_v41  ;;  %3226 = vmatpush3.bf16.msra.mxu1 %v3225_v48  ;;  %v2452_v41 = vld [vmem:[%s4163_s13 + $0x148] sm:$0xff]  ;;  %v3199_v48 = vpack.c.bf16 %v2505_v46, %v2502_v42 }
0x16ed   :  { %v3229_v45 = vpack.c.bf16 %v2452_v41, %v2449_v40 }
0x16ef   :  { %3174 = vmatpush1.bf16.msra.mxu0 %v3173_v47 }
0x16f0   :  { %3176 = vmatprep.subr.bf16.mxu0 %v3175_v49  ;;  %v3231_v49 = vpack.c.bf16 %v2506_v43, %v2503_v39 }
0x16f3   :  { %3178 = vmatpush1.bf16.msra.mxu0 %v3177_v54 }
0x16f4   :  { %3180 = vmatprep.subr.bf16.mxu0 %v3179_v55 }
0x16f7   :  { %3182 = vmatpush1.bf16.msra.mxu0 %v3181_v60 }
0x16f8   :  { %3184 = vmatprep.subr.bf16.mxu0 %v3183_v61 }
0x16fb   :  { %3186 = vmatpush1.bf16.msra.mxu0 %v3185_v2 }
0x16fc   :  { %3188 = vmatprep.subr.bf16.mxu0 %v3187_v3  ;;  %v2504_v3 = vld [vmem:[%s4163_s13 + $0x2e8] sm:$0xff] }
0x16ff   :  { %3190 = vmatpush1.bf16.msra.mxu0 %v3189_v9 }
0x1700   :  { %3192 = vmatprep.subr.bf16.mxu0 %v3191_v10 }
0x1703   :  { %3194 = vmatpush1.bf16.msra.mxu0 %v3193_v15 }
0x1704   :  { %3196 = vmatprep.subr.bf16.mxu0 %v3195_v34 }
0x176e   :  { %v2334_v18 = vpop.xlane.xlu1 %2333 }
0x176f   :  { %v2336_v20 = vmul.f32 0.03125, %v2334_v18  ;;  %v2331_v21 = vpop.xlane.xlu0 %2330  ;;  %v3201_v18 = vpack.c.bf16 %v2504_v3, %v2501_v62 }
0x1770   :  { %v2335_v22 = vmul.f32 0.03125, %v2331_v21 }
0x1771   :  { %v2338_v33 = vadd.f32 1e-05, %v2336_v20  ;;  %v3233_v20 = vpack.c.bf16 %v2458_v5, %v2455_v4 }
0x1772   :  { %v2337_v30 = vadd.f32 1e-05, %v2335_v22 }
0x1773   :  { %3301 = vrsqrt.f32 %v2338_v33 }
0x1774   :  { %3303 = vrsqrt.f32 %v2337_v30 }
0x177d   :  { %v3302_v23 = vpop.eup %3301 }
0x177e   :  { %v3304_v25 = vpop.eup %3303  ;;  %v2342_v7 = vmul.f32 %v3302_v23, %v3810_v13  ;;  %v2500_v13 = vld [vmem:[%s4163_s13 + $0x2c8] sm:$0xff] }
0x177f   :  { %v2341_v27 = vmul.f32 %v3304_v25, %v3812_v6  ;;  %v2495_v6 = vld [vmem:[%s4163_s13 + $0x2a0] sm:$0xff]  ;;  %v3227_v37 = vpack.c.bf16 %v2500_v13, %v2497_v32 }
0x1780   :  { %v2350_v29 = vmul.f32 %v2784_v24, %v2342_v7  ;;  %v3197_v38 = vpack.c.bf16 %v2498_v35, %v2495_v6  ;;  %v2507_v35 = vld [vmem:[%s4164_s14] sm:$0x7]  ;;  %s3335_s14 = smov [#allocation2]  }
0x1781   :  { %v2349_v36 = vmul.f32 %v2784_v24, %v2341_v27  ;;  %3228 = vmatprep.subr.bf16.mxu1 %v3227_v37  ;;  %v2512_v40 = vrot.slane %v2507_v35, %v3465_v17  ;;  %v2516_v41 = vrot.slane %v2507_v35, %v3471_v19 }
0x1782   :  { %v2358_v44 = vadd.f32 %v2785_v26, %v2350_v29  ;;  %3198 = vmatpush1.bf16.msra.mxu0 %v3197_v38  ;;  %3230 = vmatpush3.bf16.msra.mxu1 %v3229_v45  ;;  %v2519_v38 = vsub.s32 2, %v3458_v16 }
0x1783   :  { %v2357_v47 = vadd.f32 %v2785_v26, %v2349_v36  ;;  %3200 = vmatprep.subr.bf16.mxu0 %v3199_v48  ;;  %3232 = vmatprep.subr.bf16.mxu1 %v3231_v49  ;;  %v3334_v36 = vmov 1983009808  }
0x1784   :  { %v2371_v50 = vrot.slane %v2358_v44, 1  ;;  %v2393_v51 = vrot.slane %v2358_v44, 5  ;;  %v2387_v52 = vrot.slane %v2358_v44, 4  ;;  %v2377_v53 = vrot.slane %v2358_v44, 2 }
0x1785   :  { %v2370_v54 = vrot.slane %v2357_v47, 2  ;;  %v2392_v55 = vrot.slane %v2357_v47, 6  ;;  %v2365_v56 = vrot.slane %v2357_v47, 1  ;;  %v2386_v57 = vrot.slane %v2357_v47, 5 }
0x1786   :  { %v2376_v58 = vrot.slane %v2357_v47, 3  ;;  %v2398_v59 = vrot.slane %v2357_v47, 7  ;;  %v2399_v60 = vrot.slane %v2358_v44, 6  ;;  %v2361_v61 = vrot.slane %v2358_v44, 7  ;;  %3202 = vmatpush1.bf16.msra.mxu0 %v3201_v18  ;;  %3234 = vmatpush3.bf16.msra.mxu1 %v3233_v20 }
0x1787   :  { %v2372_v63 = vsel %vm2362_vm4, %v2371_v50, %v2370_v54  ;;  %v2394_v0 = vsel %vm2362_vm4, %v2393_v51, %v2392_v55  ;;  %v2366_v1 = vsel %vm2362_vm4, %v2358_v44, %v2365_v56  ;;  %v2388_v2 = vsel %vm2362_vm4, %v2387_v52, %v2386_v57 }
0x1788   :  { %v3247_v14 = vpack.i.bf16 %v2372_v63, %v2394_v0  ;;  %v3242_v8 = vpack.i.bf16 %v2366_v1, %v2388_v2  ;;  %v2378_v9 = vsel %vm2362_vm4, %v2377_v53, %v2376_v58  ;;  %v2400_v10 = vsel %vm2362_vm4, %v2399_v60, %v2398_v59 }
0x1789   :  { %v2382_v11 = vrot.slane %v2357_v47, 4  ;;  %v2383_v12 = vrot.slane %v2358_v44, 3  ;;  %v2363_v15 = vsel %vm2362_vm4, %v2361_v61, %v2357_v47  ;;  %v3252_v22 = vpack.i.bf16 %v2378_v9, %v2400_v10 }
0x178a   :  { %3248 = vrot.lane.b32.xlu1 %v3247_v14, %s3331_s0  ;;  %3243 = vrot.lane.b32.xlu0 %v3242_v8, %s3332_s25  ;;  %v2670_v37 = vunpack.c.l.s4 %v3334_v36  ;;  %v2520_v46 = vrot.slane %v2507_v35, %v2519_v38  ;;  %s2692_s25 = sshll.u32 %s3335_s14, 4  ;;  %s2693_s25 = int_to_ptr.vmem [resolvable:$true] %s2692_s25 }
0x178b   :  { %v2384_v21 = vsel %vm2362_vm4, %v2383_v12, %v2382_v11  ;;  %p3310_p1 = scmp.lt.s32.totalorder %s2693_s25, %s2693_s25 }
0x178c   :  { %v2671_v42 = vunpack.c.0.s8 %v2670_v37 }
0x178e   :  { %3253 = vrot.lane.b32.xlu1 %v3252_v22, %s3333_s26  ;;  %v2674_v50 = vsub.s32 %v2671_v42, %v3458_v16  ;;  %s3305_s26 = scalar_lea.vmem %s2693_s25, 96 }
0x178f   :  { %p3306_p0 = scmp.ne.s32.totalorder %s2693_s25, %s3305_s26  ;;  %p3311_p2 = scmp.lt.s32.totalorder %s3305_s26, %s3305_s26 }
0x1791   :  { %p3312_p3 = por %p3311_p2, %p3310_p1 }
0x1793   :  { %p3313_p4 = pnand %p3312_p3, %p3306_p0 }
0x17fc   :  { %v3249_v33 = vpop.permute.xlu1 %3248  ;;  %v3244_v30 = vpop.permute.xlu0 %3243 }
0x17fd   :  { %v3246_v23 = vunpack.i.h.bf16 %v3244_v30  ;;  %v3245_v24 = vunpack.i.l.bf16 %v3244_v30  ;;  %v3251_v25 = vunpack.i.h.bf16 %v3249_v33  ;;  %v3250_v26 = vunpack.i.l.bf16 %v3249_v33 }
0x17ff   :  { %v2404_v7 = vsel %vm73_vm0, %v2363_v15, %v3246_v23  ;;  %v2408_v27 = vsel %vm73_vm0, %v2384_v21, %v3245_v24 }
0x1800   :  { %v3254_v28 = vpop.permute.xlu1 %3253  ;;  %v2409_v29 = vsel %vm841_vm3, %v2408_v27, %v3250_v26  ;;  %v2405_v34 = vsel %vm841_vm3, %v2404_v7, %v3251_v25 }
0x1801   :  { %v3256_v31 = vunpack.i.h.bf16 %v3254_v28  ;;  %v3255_v32 = vunpack.i.l.bf16 %v3254_v28 }
0x1803   :  { %v2410_v13 = vsel %vm2406_vm5, %v2409_v29, %v3255_v32  ;;  %v2407_v6 = vsel %vm2406_vm5, %v2405_v34, %v3256_v31 }
0x1804   :  { %2588 = vmatprep.mubr.f32.mxu0 %v2410_v13  ;;  %2659 = vmatprep.mubr.f32.mxu1 %v2410_v13 }
0x1805   :  { %2589 = vmatmul.mubr.f32.vlgmr.msra.gmra.mrb[24].mxu0 %v2407_v6  ;;  %2660 = vmatmul.mubr.f32.vlgmr.msra.gmra.mrb[28].mxu1 %v2407_v6 }
0x18d8   :  { %v2590_v44 = vpop.f32.mrb[24].mxu0  ;;  %v2894_v45 = vpop.f32.mrb[28].mxu1 }
0x18d9   :  { %v2591_v39 = vadd.f32 %v2590_v44, %v2512_v40  ;;  %v2592_v43 = vpop.f32.mrb[25].mxu0  ;;  %v2895_v47 = vpop.f32.mrb[29].mxu1 }
0x18da   :  { %v2593_v48 = vadd.f32 %v2592_v43, %v2516_v41  ;;  %v2896_v49 = vadd.f32 %v2895_v47, %v2894_v45 }
0x18dc   :  { %v2668_v51 = vcombine.low %v2591_v39, %v2593_v48  ;;  %v2662_v52 = vadd.f32 %v2896_v49, %v2520_v46 }
0x18de   :  { %v2675_v53 = vrot.slane %v2668_v51, %v2674_v50  ;;  %v2682_v54 = vrot.slane %v2662_v52, %v2674_v50 }
0x18e0   :  { %v2683_v17 = vcombine.low %v2675_v53, %v2682_v54 }
0x18e2   :  { %2685 = vst [vmem:[#allocation2] sm:$0x3f] %v2683_v17 }
0x18e3   :  { %3316 = shalt.err (!%p3313_p4)
}
0x18e4   :  { %s3317_s20 = scalar_lea.hbm %s4165_s15, 96 }
0x18e5   :  { %p3318_p5 = scmp.ne.s32.totalorder %s4165_s15, %s3317_s20  ;;  %p3321_p6 = scmp.lt.u32.totalorder %s3317_s20, %s4165_s15 }
0x18e7   :  { %p3323_p7 = pnand %p3321_p6, %p3318_p5 }
0x18e9   :  { %3326 = shalt.err (!%p3323_p7)
}
0x18ea   :  { %2695 = dma.vmem_to_hbm [thread:$0]  %s2693_s25, 96, %s4165_s15, [#allocation3]  }
0x18eb   :  { %3327 = dma.done.wait [#allocation3], 96  }
0x18ec   :  { %3328 = vsyncadd [#allocation3], 4294967200 }
0x18ed   :  { %2699 = vsyncpa [#allocation3], 1 }

</bundles_post_ra>
